<compile_context>
chip_gen: v7x
topology: tpu7x:2x2x1
jax: 0.10.0
libtpu: 0.0.40
codegen_flags: <defaults>
</compile_context>

<pallas_src>
import math
import functools

import jax
import jax.numpy as jnp
from jax.experimental import pallas as pl
from jax.experimental.pallas import tpu as pltpu

# ---------------- model dims (small, consistent with the module) ----------------
B = 2        # batch
S = 8        # sequence length
D = 32       # d_model
H = 4        # heads
DK = D // H  # d_k = 8
F = 64       # d_ff
EPS = 1e-6


# ---------------- packed-parameter slab layout (static, shared wrapper/kernel) ----
def _round8(n):
    return ((n + 7) // 8) * 8


def _slab_layout(d, f):
    """Row offsets of each parameter inside the single (rows, lanes) f32 slab."""
    sections = [("wqkv", d, 3 * d), ("bqkv", 1, 3 * d),
                ("wo", d, d), ("bo", 1, d),
                ("w1", d, f), ("b1", 1, f),
                ("w2", f, d), ("b2", 1, d)]
    layout = {}
    row = 0
    max_cols = 0
    for name, nrows, ncols in sections:
        layout[name] = (row, nrows, ncols)   # 8-row-aligned start -> aligned sublane slices
        row += _round8(nrows)
        max_cols = max(max_cols, ncols)
    rows = _round8(row)
    lanes = ((max_cols + 127) // 128) * 128
    return layout, rows, lanes


def _pack_slab(params, d, f):
    layout, rows, lanes = _slab_layout(d, f)
    wqkv = jnp.concatenate([params["wq"], params["wk"], params["wv"]], axis=1)   # (D, 3D)
    bqkv = jnp.concatenate([params["bq"], params["bk"], params["bv"]], axis=1)   # (1, 3D)
    entries = {"wqkv": wqkv, "bqkv": bqkv,
               "wo": params["wo"], "bo": params["bo"],
               "w1": params["w1"], "b1": params["b1"],
               "w2": params["w2"], "b2": params["b2"]}
    slab = jnp.zeros((rows, lanes), jnp.float32)
    for name, arr in entries.items():
        r0, nr, nc = layout[name]
        slab = slab.at[r0:r0 + nr, 0:nc].set(arr.astype(jnp.float32))
    return slab


# ---------------- kernel ----------------
def _encoder_kernel(ln_ref, x_ref, mbias_ref, slab_ref, o_ref,
                    *, bb, s, d, h, dk, f, eps, layout):
    # Per-grid-step tiles: x (bb,S,D), mbias (bb,S,S) f32.  All weights arrive as one
    # packed f32 slab; sections are read with static (8-row-aligned) slices.
    x3 = x_ref[...].astype(jnp.float32)          # (bb, S, D)
    r = bb * s
    xf = x3.reshape(r, d)                        # (R, D): batch*seq rows

    # LayerNorm params (torch init: ones(1)/zeros(1)), scalars read from SMEM.
    a1 = ln_ref[0]
    g1 = ln_ref[1]
    a2 = ln_ref[2]
    g2 = ln_ref[3]

    def param(name):
        r0, nr, nc = layout[name]
        return slab_ref[r0:r0 + nr, 0:nc]        # static slice of the packed slab

    def layer_norm(v, alpha, beta):
        # torch.std is *unbiased* (divides by N-1); eps is added to std (not var).
        mean = jnp.mean(v, axis=-1, keepdims=True)
        diff = v - mean
        var = jnp.sum(diff * diff, axis=-1, keepdims=True) / (d - 1)
        inv = 1.0 / (jnp.sqrt(var) + eps)        # one divide per row, then multiply
        return alpha * (diff * inv) + beta

    # ---------------- sublayer 1: multi-head self attention ----------------
    xn = layer_norm(xf, a1, g1)                                          # (R, D)

    # Fused QKV: one (R,32)@(32,96) MXU matmul, 96-lane output.
    qkv = jnp.dot(xn, param("wqkv"), preferred_element_type=jnp.float32) + param("bqkv")

    scale = 1.0 / math.sqrt(dk)

    def heads(mat):                               # (R, D) -> (bb*h, S, DK)
        return mat.reshape(bb, s, h, dk).transpose(0, 2, 1, 3).reshape(bb * h, s, dk)

    q = heads(qkv[:, 0:d] * scale)                # fold 1/sqrt(dk) once into q
    k = heads(qkv[:, d:2 * d])
    v = heads(qkv[:, 2 * d:3 * d])

    # Mask bias precomputed wrapper-side; broadcast over heads once.
    mbias = jnp.broadcast_to(mbias_ref[...][:, None, :, :],
                             (bb, h, s, s)).reshape(bb * h, s, s)

    sc = jnp.einsum('bqd,bkd->bqk', q, k, preferred_element_type=jnp.float32) + mbias
    mx = jnp.max(sc, axis=-1, keepdims=True)
    ex = jnp.exp(sc - mx)
    p = ex / jnp.sum(ex, axis=-1, keepdims=True)
    # TODO(synk): attention / residual / FFN dropout omitted (eval mode -> identity).
    ctx = jnp.einsum('bqk,bkd->bqd', p, v, preferred_element_type=jnp.float32)  # (bb*h,S,DK)

    # Concat heads and project with ONE (R,32)@(32,32) matmul (== per-head proj + sum).
    ctx = ctx.reshape(bb, h, s, dk).transpose(0, 2, 1, 3).reshape(r, d)
    attn = jnp.dot(ctx, param("wo"), preferred_element_type=jnp.float32) + param("bo")

    x1 = xf + attn      # residual (dropout == identity in eval)

    # ---------------- sublayer 2: feed-forward ----------------
    xn2 = layer_norm(x1, a2, g2)
    hid = jnp.maximum(
        jnp.dot(xn2, param("w1"), preferred_element_type=jnp.float32) + param("b1"), 0.0)
    ffn = jnp.dot(hid, param("w2"), preferred_element_type=jnp.float32) + param("b2")

    o_ref[...] = (x1 + ffn).reshape(bb, s, d).astype(o_ref.dtype)


# ---------------- wrapper ----------------
def _num_tensorcores():
    """Best-effort TensorCore count (v7x has 2 per chip); safe fallback to 1."""
    try:
        info = pltpu.get_tpu_info()
    except Exception:
        return 1
    for attr in ("num_cores", "core_count", "num_tensorcores",
                 "tensorcore_count", "cores_per_chip"):
        n = getattr(info, attr, None)
        if isinstance(n, int) and n > 0:
            return n
    return 1


def encoder_block_pallas(x, mask, params, *, block_b=None):
    """x: (B,S,D) f32, mask: (B,S,S) int (0 = masked key). Returns (B,S,D) f32.

    block_b: batch elements per grid step.  Default = ceil(B / #TensorCores):
    grid of one step on single-TC v5e/v6e (no per-step overhead), batch split
    across the two TensorCores on v7x via the "parallel" grid axis.
    """
    b, s, d = x.shape
    f = params["w1"].shape[1]
    h = H
    dk = d // h

    if block_b is None:
        ncores = _num_tensorcores()
        block_b = max(1, -(-b // ncores))        # ceil(b / ncores)
        while b % block_b != 0:
            block_b += 1
    assert b % block_b == 0, "block_b must divide batch"
    n_blocks = b // block_b

    # Wrapper-side (one-time) param packing and additive mask bias.
    layout, rows, lanes = _slab_layout(d, f)
    slab = _pack_slab(params, d, f)
    mbias = jnp.where(mask == 0, jnp.float32(-1e9), jnp.float32(0.0))    # (B,S,S) f32

    kernel = functools.partial(_encoder_kernel, bb=block_b, s=s, d=d, h=h, dk=dk,
                               f=f, eps=EPS, layout=layout)

    in_specs = [
        pl.BlockSpec(memory_space=pltpu.MemorySpace.SMEM),               # ln scalar params
        pl.BlockSpec((block_b, s, d), lambda i: (i, 0, 0)),              # x
        pl.BlockSpec((block_b, s, s), lambda i: (i, 0, 0)),              # mask bias (f32)
        pl.BlockSpec((rows, lanes), lambda i: (0, 0)),                   # packed param slab
    ]
    out_spec = pl.BlockSpec((block_b, s, d), lambda i: (i, 0, 0))

    return pl.pallas_call(
        kernel,
        out_shape=jax.ShapeDtypeStruct((b, s, d), jnp.float32),
        grid=(n_blocks,),
        in_specs=in_specs,
        out_specs=out_spec,
        compiler_params=pltpu.CompilerParams(dimension_semantics=("parallel",)),
    )(params["ln"], x, mbias, slab)


# ---------------- plain-JAX reference (mirrors the PyTorch forward) ----------------
def encoder_block_ref(x, mask, params):
    ln = params["ln"]

    def layer_norm(v, alpha, beta):
        mean = jnp.mean(v, axis=-1, keepdims=True)
        var = jnp.sum((v - mean) ** 2, axis=-1, keepdims=True) / (v.shape[-1] - 1)
        std = jnp.sqrt(var)
        return alpha * (v - mean) / (std + EPS) + beta

    xn = layer_norm(x, ln[0], ln[1])
    q = xn @ params["wq"] + params["bq"][0]
    k = xn @ params["wk"] + params["bk"][0]
    v = xn @ params["wv"] + params["bv"][0]
    bsz, s, d = x.shape
    q = q.reshape(bsz, s, H, DK).transpose(0, 2, 1, 3)
    k = k.reshape(bsz, s, H, DK).transpose(0, 2, 1, 3)
    v = v.reshape(bsz, s, H, DK).transpose(0, 2, 1, 3)
    scores = jnp.einsum("bhqd,bhkd->bhqk", q, k) / math.sqrt(DK)
    scores = jnp.where(mask[:, None, :, :] == 0, -1e9, scores)
    probs = jax.nn.softmax(scores, axis=-1)
    ctx = jnp.einsum("bhqk,bhkd->bhqd", probs, v).transpose(0, 2, 1, 3).reshape(bsz, s, d)
    attn_out = ctx @ params["wo"] + params["bo"][0]
    x1 = x + attn_out
    xn2 = layer_norm(x1, ln[2], ln[3])
    ffn = jnp.maximum(xn2 @ params["w1"] + params["b1"][0], 0.0) @ params["w2"] + params["b2"][0]
    return x1 + ffn


def init_params(key):
    ks = jax.random.split(key, 8)
    scale = 0.05
    p = {
        "ln": jnp.array([1.0, 0.0, 1.0, 0.0], dtype=jnp.float32),  # alpha1,bias1,alpha2,bias2
        "wq": scale * jax.random.normal(ks[0], (D, D), jnp.float32),
        "bq": scale * jax.random.normal(ks[1], (1, D), jnp.float32),
        "wk": scale * jax.random.normal(ks[2], (D, D), jnp.float32),
        "bk": jnp.zeros((1, D), jnp.float32),
        "wv": scale * jax.random.normal(ks[3], (D, D), jnp.float32),
        "bv": jnp.zeros((1, D), jnp.float32),
        "wo": scale * jax.random.normal(ks[4], (D, D), jnp.float32),
        "bo": jnp.zeros((1, D), jnp.float32),
        "w1": scale * jax.random.normal(ks[5], (D, F), jnp.float32),
        "b1": scale * jax.random.normal(ks[6], (1, F), jnp.float32),
        "w2": scale * jax.random.normal(ks[7], (F, D), jnp.float32),
        "b2": jnp.zeros((1, D), jnp.float32),
    }
    return p


if __name__ == "__main__":
    key = jax.random.PRNGKey(0)
    kx, kp = jax.random.split(key)
    x = jax.random.normal(kx, (B, S, D), jnp.float32)

    # src_mask: mask out the trailing positions of each sequence (key axis).
    lengths = jnp.array([S, S - 2], dtype=jnp.int32)
    key_valid = (jnp.arange(S)[None, :] < lengths[:, None]).astype(jnp.int32)  # (B, S)
    mask = jnp.broadcast_to(key_valid[:, None, :], (B, S, S)).astype(jnp.int32)

    params = init_params(kp)

    out = encoder_block_pallas(x, mask, params)
    out = jax.block_until_ready(out)

    ref = encoder_block_ref(x, mask, params)
    assert out.shape == (B, S, D)
    assert jnp.allclose(out, ref, atol=1e-4, rtol=1e-4), float(jnp.max(jnp.abs(out - ref)))

    print("KERNEL_OK")
</pallas_src>

<mosaic_0001>
module attributes {stable_mosaic.version = 11 : i64} {
  func.func @_encoder_kernel(%arg0: i32, %arg1: memref<4xf32, #tpu.memory_space<smem>>, %arg2: memref<2x8x32xf32, #tpu.memory_space<vmem>>, %arg3: memref<2x8x8xf32, #tpu.memory_space<vmem>>, %arg4: memref<192x128xf32, #tpu.memory_space<vmem>>, %arg5: memref<2x8x32xf32, #tpu.memory_space<vmem>>) attributes {dimension_semantics = [#tpu.dimension_semantics<parallel>], iteration_bounds = array<i64: 1>, scalar_prefetch = 0 : i64, scratch_operands = 0 : i64, tpu.core_type = #tpu.core_type<tc>, window_params = [{transform_indices = @transform_0, window_bounds = array<i64: 4>}, {transform_indices = @transform_1, window_bounds = array<i64: 2, 8, 32>}, {transform_indices = @transform_2, window_bounds = array<i64: 2, 8, 8>}, {pipeline_mode = #tpu.pipeline_mode<synchronous>, transform_indices = @transform_3, window_bounds = array<i64: 192, 128>}, {transform_indices = @transform_4, window_bounds = array<i64: 2, 8, 32>}]} {
    %c0 = arith.constant 0 : index
    %c0_0 = arith.constant 0 : index
    %c0_1 = arith.constant 0 : index
    %0 = vector.load %arg2[%c0, %c0_0, %c0_1] : memref<2x8x32xf32, #tpu.memory_space<vmem>>, vector<2x8x32xf32>
    %1 = vector.shape_cast %0 : vector<2x8x32xf32> to vector<16x32xf32>
    %c0_2 = arith.constant 0 : index
    %2 = memref.load %arg1[%c0_2] : memref<4xf32, #tpu.memory_space<smem>>
    %c1 = arith.constant 1 : index
    %3 = memref.load %arg1[%c1] : memref<4xf32, #tpu.memory_space<smem>>
    %c2 = arith.constant 2 : index
    %4 = memref.load %arg1[%c2] : memref<4xf32, #tpu.memory_space<smem>>
    %c3 = arith.constant 3 : index
    %5 = memref.load %arg1[%c3] : memref<4xf32, #tpu.memory_space<smem>>
    %cst = arith.constant dense<0.000000e+00> : vector<16xf32>
    %6 = vector.multi_reduction <add>, %1, %cst [1] : vector<16x32xf32> to vector<16xf32>
    %7 = vector.shape_cast %6 : vector<16xf32> to vector<16x1xf32>
    %cst_3 = arith.constant 3.200000e+01 : f32
    %8 = vector.broadcast %cst_3 : f32 to vector<16x1xf32>
    %9 = arith.divf %7, %8 : vector<16x1xf32>
    %10 = vector.broadcast %9 : vector<16x1xf32> to vector<16x32xf32>
    %11 = arith.subf %1, %10 : vector<16x32xf32>
    %12 = arith.mulf %11, %11 : vector<16x32xf32>
    %cst_4 = arith.constant dense<0.000000e+00> : vector<16xf32>
    %13 = vector.multi_reduction <add>, %12, %cst_4 [1] : vector<16x32xf32> to vector<16xf32>
    %14 = vector.shape_cast %13 : vector<16xf32> to vector<16x1xf32>
    %cst_5 = arith.constant 3.100000e+01 : f32
    %15 = vector.broadcast %cst_5 : f32 to vector<16x1xf32>
    %16 = arith.divf %14, %15 : vector<16x1xf32>
    %17 = math.sqrt %16 : vector<16x1xf32>
    %cst_6 = arith.constant 9.99999997E-7 : f32
    %18 = vector.broadcast %cst_6 : f32 to vector<16x1xf32>
    %19 = arith.addf %17, %18 : vector<16x1xf32>
    %cst_7 = arith.constant 1.000000e+00 : f32
    %20 = vector.broadcast %cst_7 : f32 to vector<16x1xf32>
    %21 = arith.divf %20, %19 : vector<16x1xf32>
    %22 = vector.broadcast %21 : vector<16x1xf32> to vector<16x32xf32>
    %23 = arith.mulf %11, %22 : vector<16x32xf32>
    %24 = vector.broadcast %2 : f32 to vector<16x32xf32>
    %25 = arith.mulf %24, %23 : vector<16x32xf32>
    %26 = vector.broadcast %3 : f32 to vector<16x32xf32>
    %27 = arith.addf %25, %26 : vector<16x32xf32>
    %c0_8 = arith.constant 0 : index
    %c0_9 = arith.constant 0 : index
    %28 = vector.load %arg4[%c0_8, %c0_9] : memref<192x128xf32, #tpu.memory_space<vmem>>, vector<32x96xf32>
    %cst_10 = arith.constant dense<0.000000e+00> : vector<16x96xf32>
    %29 = tpu.matmul %27, %28, %cst_10 {dimension_numbers = #tpu.dot_dimension_numbers<[1], [0], [0], [1], [0, 0, 1, 1], [], []>} : vector<16x32xf32>, vector<32x96xf32>, vector<16x96xf32> -> vector<16x96xf32>
    %c32 = arith.constant 32 : index
    %c0_11 = arith.constant 0 : index
    %30 = vector.load %arg4[%c32, %c0_11] : memref<192x128xf32, #tpu.memory_space<vmem>>, vector<1x96xf32>
    %31 = vector.broadcast %30 : vector<1x96xf32> to vector<16x96xf32>
    %32 = arith.addf %29, %31 : vector<16x96xf32>
    %33 = vector.extract_strided_slice %32 {offsets = [0, 0], sizes = [16, 32], strides = [1, 1]} : vector<16x96xf32> to vector<16x32xf32>
    %cst_12 = arith.constant 0.353553385 : f32
    %34 = vector.broadcast %cst_12 : f32 to vector<16x32xf32>
    %35 = arith.mulf %33, %34 : vector<16x32xf32>
    %36 = vector.shape_cast %35 : vector<16x32xf32> to vector<2x8x4x8xf32>
    %37 = tpu.transpose %36, [0, 2, 1, 3] : vector<2x8x4x8xf32> -> vector<2x4x8x8xf32>
    %38 = vector.shape_cast %37 : vector<2x4x8x8xf32> to vector<8x8x8xf32>
    %39 = vector.extract_strided_slice %32 {offsets = [0, 32], sizes = [16, 32], strides = [1, 1]} : vector<16x96xf32> to vector<16x32xf32>
    %40 = vector.shape_cast %39 : vector<16x32xf32> to vector<2x8x4x8xf32>
    %41 = tpu.transpose %40, [0, 2, 1, 3] : vector<2x8x4x8xf32> -> vector<2x4x8x8xf32>
    %42 = vector.shape_cast %41 : vector<2x4x8x8xf32> to vector<8x8x8xf32>
    %43 = vector.extract_strided_slice %32 {offsets = [0, 64], sizes = [16, 32], strides = [1, 1]} : vector<16x96xf32> to vector<16x32xf32>
    %44 = vector.shape_cast %43 : vector<16x32xf32> to vector<2x8x4x8xf32>
    %45 = tpu.transpose %44, [0, 2, 1, 3] : vector<2x8x4x8xf32> -> vector<2x4x8x8xf32>
    %46 = vector.shape_cast %45 : vector<2x4x8x8xf32> to vector<8x8x8xf32>
    %c0_13 = arith.constant 0 : index
    %c0_14 = arith.constant 0 : index
    %c0_15 = arith.constant 0 : index
    %47 = vector.load %arg3[%c0_13, %c0_14, %c0_15] : memref<2x8x8xf32, #tpu.memory_space<vmem>>, vector<2x8x8xf32>
    %48 = vector.shape_cast %47 : vector<2x8x8xf32> to vector<2x1x8x8xf32>
    %49 = vector.shape_cast %48 : vector<2x1x8x8xf32> to vector<2x1x8x8xf32>
    %50 = vector.broadcast %49 : vector<2x1x8x8xf32> to vector<2x4x8x8xf32>
    %51 = vector.shape_cast %50 : vector<2x4x8x8xf32> to vector<8x8x8xf32>
    "tpu.trace_start"() <{level = 10 : i32, message = "bqd,bkd->bqk"}> : () -> ()
    %cst_16 = arith.constant dense<0.000000e+00> : vector<8x8x8xf32>
    %52 = tpu.matmul %38, %42, %cst_16 {dimension_numbers = #tpu.dot_dimension_numbers<[2], [2], [1], [1], [0, 0, 0, 1, 1, 1], [0], [0]>} : vector<8x8x8xf32>, vector<8x8x8xf32>, vector<8x8x8xf32> -> vector<8x8x8xf32>
    "tpu.trace_stop"() : () -> ()
    %53 = arith.addf %52, %51 : vector<8x8x8xf32>
    %cst_17 = arith.constant dense<0xFF800000> : vector<8x8xf32>
    %54 = vector.multi_reduction <maximumf>, %53, %cst_17 [2] : vector<8x8x8xf32> to vector<8x8xf32>
    %55 = vector.shape_cast %54 : vector<8x8xf32> to vector<8x8x1xf32>
    %56 = vector.broadcast %55 : vector<8x8x1xf32> to vector<8x8x8xf32>
    %57 = arith.subf %53, %56 : vector<8x8x8xf32>
    %58 = math.exp %57 : vector<8x8x8xf32>
    %cst_18 = arith.constant dense<0.000000e+00> : vector<8x8xf32>
    %59 = vector.multi_reduction <add>, %58, %cst_18 [2] : vector<8x8x8xf32> to vector<8x8xf32>
    %60 = vector.shape_cast %59 : vector<8x8xf32> to vector<8x8x1xf32>
    %61 = vector.broadcast %60 : vector<8x8x1xf32> to vector<8x8x8xf32>
    %62 = arith.divf %58, %61 : vector<8x8x8xf32>
    "tpu.trace_start"() <{level = 10 : i32, message = "bqk,bkd->bqd"}> : () -> ()
    %cst_19 = arith.constant dense<0.000000e+00> : vector<8x8x8xf32>
    %63 = tpu.matmul %62, %46, %cst_19 {dimension_numbers = #tpu.dot_dimension_numbers<[2], [1], [1], [2], [0, 0, 0, 1, 1, 2], [0], [0]>} : vector<8x8x8xf32>, vector<8x8x8xf32>, vector<8x8x8xf32> -> vector<8x8x8xf32>
    "tpu.trace_stop"() : () -> ()
    %64 = vector.shape_cast %63 : vector<8x8x8xf32> to vector<2x4x8x8xf32>
    %65 = tpu.transpose %64, [0, 2, 1, 3] : vector<2x4x8x8xf32> -> vector<2x8x4x8xf32>
    %66 = vector.shape_cast %65 : vector<2x8x4x8xf32> to vector<16x32xf32>
    %c40 = arith.constant 40 : index
    %c0_20 = arith.constant 0 : index
    %67 = vector.load %arg4[%c40, %c0_20] : memref<192x128xf32, #tpu.memory_space<vmem>>, vector<32x32xf32>
    %cst_21 = arith.constant dense<0.000000e+00> : vector<16x32xf32>
    %68 = tpu.matmul %66, %67, %cst_21 {dimension_numbers = #tpu.dot_dimension_numbers<[1], [0], [0], [1], [0, 0, 1, 1], [], []>} : vector<16x32xf32>, vector<32x32xf32>, vector<16x32xf32> -> vector<16x32xf32>
    %c72 = arith.constant 72 : index
    %c0_22 = arith.constant 0 : index
    %69 = vector.load %arg4[%c72, %c0_22] : memref<192x128xf32, #tpu.memory_space<vmem>>, vector<1x32xf32>
    %70 = vector.broadcast %69 : vector<1x32xf32> to vector<16x32xf32>
    %71 = arith.addf %68, %70 : vector<16x32xf32>
    %72 = arith.addf %1, %71 : vector<16x32xf32>
    %cst_23 = arith.constant dense<0.000000e+00> : vector<16xf32>
    %73 = vector.multi_reduction <add>, %72, %cst_23 [1] : vector<16x32xf32> to vector<16xf32>
    %74 = vector.shape_cast %73 : vector<16xf32> to vector<16x1xf32>
    %cst_24 = arith.constant 3.200000e+01 : f32
    %75 = vector.broadcast %cst_24 : f32 to vector<16x1xf32>
    %76 = arith.divf %74, %75 : vector<16x1xf32>
    %77 = vector.broadcast %76 : vector<16x1xf32> to vector<16x32xf32>
    %78 = arith.subf %72, %77 : vector<16x32xf32>
    %79 = arith.mulf %78, %78 : vector<16x32xf32>
    %cst_25 = arith.constant dense<0.000000e+00> : vector<16xf32>
    %80 = vector.multi_reduction <add>, %79, %cst_25 [1] : vector<16x32xf32> to vector<16xf32>
    %81 = vector.shape_cast %80 : vector<16xf32> to vector<16x1xf32>
    %cst_26 = arith.constant 3.100000e+01 : f32
    %82 = vector.broadcast %cst_26 : f32 to vector<16x1xf32>
    %83 = arith.divf %81, %82 : vector<16x1xf32>
    %84 = math.sqrt %83 : vector<16x1xf32>
    %cst_27 = arith.constant 9.99999997E-7 : f32
    %85 = vector.broadcast %cst_27 : f32 to vector<16x1xf32>
    %86 = arith.addf %84, %85 : vector<16x1xf32>
    %cst_28 = arith.constant 1.000000e+00 : f32
    %87 = vector.broadcast %cst_28 : f32 to vector<16x1xf32>
    %88 = arith.divf %87, %86 : vector<16x1xf32>
    %89 = vector.broadcast %88 : vector<16x1xf32> to vector<16x32xf32>
    %90 = arith.mulf %78, %89 : vector<16x32xf32>
    %91 = vector.broadcast %4 : f32 to vector<16x32xf32>
    %92 = arith.mulf %91, %90 : vector<16x32xf32>
    %93 = vector.broadcast %5 : f32 to vector<16x32xf32>
    %94 = arith.addf %92, %93 : vector<16x32xf32>
    %c80 = arith.constant 80 : index
    %c0_29 = arith.constant 0 : index
    %95 = vector.load %arg4[%c80, %c0_29] : memref<192x128xf32, #tpu.memory_space<vmem>>, vector<32x64xf32>
    %cst_30 = arith.constant dense<0.000000e+00> : vector<16x64xf32>
    %96 = tpu.matmul %94, %95, %cst_30 {dimension_numbers = #tpu.dot_dimension_numbers<[1], [0], [0], [1], [0, 0, 1, 1], [], []>} : vector<16x32xf32>, vector<32x64xf32>, vector<16x64xf32> -> vector<16x64xf32>
    %c112 = arith.constant 112 : index
    %c0_31 = arith.constant 0 : index
    %97 = vector.load %arg4[%c112, %c0_31] : memref<192x128xf32, #tpu.memory_space<vmem>>, vector<1x64xf32>
    %98 = vector.broadcast %97 : vector<1x64xf32> to vector<16x64xf32>
    %99 = arith.addf %96, %98 : vector<16x64xf32>
    %cst_32 = arith.constant 0.000000e+00 : f32
    %100 = vector.broadcast %cst_32 : f32 to vector<16x64xf32>
    %101 = arith.maximumf %99, %100 : vector<16x64xf32>
    %c120 = arith.constant 120 : index
    %c0_33 = arith.constant 0 : index
    %102 = vector.load %arg4[%c120, %c0_33] : memref<192x128xf32, #tpu.memory_space<vmem>>, vector<64x32xf32>
    %cst_34 = arith.constant dense<0.000000e+00> : vector<16x32xf32>
    %103 = tpu.matmul %101, %102, %cst_34 {dimension_numbers = #tpu.dot_dimension_numbers<[1], [0], [0], [1], [0, 0, 1, 1], [], []>} : vector<16x64xf32>, vector<64x32xf32>, vector<16x32xf32> -> vector<16x32xf32>
    %c184 = arith.constant 184 : index
    %c0_35 = arith.constant 0 : index
    %104 = vector.load %arg4[%c184, %c0_35] : memref<192x128xf32, #tpu.memory_space<vmem>>, vector<1x32xf32>
    %105 = vector.broadcast %104 : vector<1x32xf32> to vector<16x32xf32>
    %106 = arith.addf %103, %105 : vector<16x32xf32>
    %107 = arith.addf %72, %106 : vector<16x32xf32>
    %108 = vector.shape_cast %107 : vector<16x32xf32> to vector<2x8x32xf32>
    %c0_36 = arith.constant 0 : index
    %c0_37 = arith.constant 0 : index
    %c0_38 = arith.constant 0 : index
    %109 = vector.load %arg5[%c0_36, %c0_37, %c0_38] : memref<2x8x32xf32, #tpu.memory_space<vmem>>, vector<2x8x32xf32>
    tpu.vector_store %arg5[%c0_36, %c0_37, %c0_38], %108 {strides = array<i32>} : memref<2x8x32xf32, #tpu.memory_space<vmem>>, vector<2x8x32xf32>,
    return
  }
  func.func @transform_0(%arg0: i32) -> i32 {
    %c0_i32 = arith.constant 0 : i32
    %c0_i32_0 = arith.constant 0 : i32
    return %c0_i32 : i32
  }
  func.func @transform_1(%arg0: i32) -> (i32, i32, i32) {
    %c0_i32 = arith.constant 0 : i32
    %c0_i32_0 = arith.constant 0 : i32
    %c0_i32_1 = arith.constant 0 : i32
    return %arg0, %c0_i32, %c0_i32_0 : i32, i32, i32
  }
  func.func @transform_2(%arg0: i32) -> (i32, i32, i32) {
    %c0_i32 = arith.constant 0 : i32
    %c0_i32_0 = arith.constant 0 : i32
    %c0_i32_1 = arith.constant 0 : i32
    return %arg0, %c0_i32, %c0_i32_0 : i32, i32, i32
  }
  func.func @transform_3(%arg0: i32) -> (i32, i32) {
    %c0_i32 = arith.constant 0 : i32
    %c0_i32_0 = arith.constant 0 : i32
    %c0_i32_1 = arith.constant 0 : i32
    return %c0_i32, %c0_i32_0 : i32, i32
  }
  func.func @transform_4(%arg0: i32) -> (i32, i32, i32) {
    %c0_i32 = arith.constant 0 : i32
    %c0_i32_0 = arith.constant 0 : i32
    %c0_i32_1 = arith.constant 0 : i32
    return %arg0, %c0_i32, %c0_i32_0 : i32, i32, i32
  }
}

</mosaic_0001>

<bundles_post_ra>
// kernel: tpu_custom_call.1
= control target key start
LH: loop header
LB: loop body
LE: loop exit
PB: predicated region body
PF: predicated region fallthrough
CT: control target
= control target key end

     0   :  { %9 = vsyncpa [#allocation5], 0  ;;  %s4039_s0 = inlined_call_operand.hbm [shape: f32[4], index: 0, kind: input, shape index: {}]   ;;  %s4040_s1 = inlined_call_operand.hbm [shape: f32[2,8,32], index: 1, kind: input, shape index: {}]   ;;  %s4041_s2 = inlined_call_operand.hbm [shape: f32[2,8,8], index: 2, kind: input, shape index: {}]   ;;  %s4042_s3 = inlined_call_operand.hbm [shape: f32[192,128], index: 3, kind: input, shape index: {}]   ;;  %s4043_s4 = inlined_call_operand.hbm [shape: f32[2,8,32], index: 4, kind: output, shape index: {}]  }
   0x1   :  { %10 = vsyncpa [#allocation3], 0 }
   0x2   :  { %11 = vsyncpa [#allocation8], 0 }
   0x3   :  { %12 = vsyncpa [#allocation4], 0  ;;  %s3515_s15 = smov [#allocation7]   ;;  %s3516_s17 = smov [#allocation6]  }
   0x4   :  { %s38_s16 = sshll.u32 %s3515_s15, 4  ;;  %s26_s18 = sshll.u32 %s3516_s17, 4  ;;  %s39_s16 = int_to_ptr.vmem [resolvable:$true] %s38_s16  ;;  %s27_s18 = int_to_ptr.vmem [resolvable:$true] %s26_s18 }
   0x5   :  { %s3409_s21 = scalar_lea.hbm %s4041_s2, 256 }
   0x6   :  { %p3410_p0 = scmp.ne.s32.totalorder %s4041_s2, %s3409_s21  ;;  %p3413_p1 = scmp.lt.u32.totalorder %s3409_s21, %s4041_s2 }
   0x8   :  { %p3415_p2 = pnand %p3413_p1, %p3410_p0 }
   0xa   :  { %3418 = shalt.err (!%p3415_p2)
}
   0xb   :  { %s3419_s26 = scalar_lea.vmem %s39_s16, 256  ;;  %p3424_p4 = scmp.lt.s32.totalorder %s39_s16, %s39_s16 }
   0xc   :  { %p3420_p3 = scmp.ne.s32.totalorder %s39_s16, %s3419_s26  ;;  %p3425_p5 = scmp.lt.s32.totalorder %s3419_s26, %s3419_s26 }
   0xe   :  { %p3426_p6 = por %p3425_p5, %p3424_p4 }
  0x10   :  { %p3427_p7 = pnand %p3426_p6, %p3420_p3 }
  0x12   :  { %3430 = shalt.err (!%p3427_p7)
}
  0x13   :  { %s3517_s27 = smov 128   ;;  %s3518_s28 = smov 8  }
  0x14   :  { %44 = dma.hbm_to_vmem [thread:$0]  %s4041_s2, 256, %s39_s16, [#allocation8], %s3517_s27, %s3517_s27, %s3518_s28  }
  0x15   :  { %s3431_s7 = scalar_lea.hbm %s4039_s0, 16 }
  0x16   :  { %p3432_p8 = scmp.ne.s32.totalorder %s4039_s0, %s3431_s7  ;;  %p3435_p9 = scmp.lt.u32.totalorder %s3431_s7, %s4039_s0 }
  0x18   :  { %p3437_p10 = pnand %p3435_p9, %p3432_p8 }
  0x1a   :  { %3440 = shalt.err (!%p3437_p10)
}
  0x1b   :  { %s3519_s12 = smov [#allocation2]   ;;  %s3441_s16 = scalar_lea.hbm %s4040_s1, 256 }
  0x1c   :  { %20 = dma.hbm_to_smem %s4039_s0, 16, %s3519_s12, [#allocation5]  }
  0x1d   :  { %p3442_p11 = scmp.ne.s32.totalorder %s4040_s1, %s3441_s16  ;;  %p3445_p12 = scmp.lt.u32.totalorder %s3441_s16, %s4040_s1 }
  0x1f   :  { %p3447_p13 = pnand %p3445_p12, %p3442_p11 }
  0x21   :  { %3450 = shalt.err (!%p3447_p13)
}
  0x22   :  { %s3451_s22 = scalar_lea.vmem %s27_s18, 256  ;;  %p3456_p1 = scmp.lt.s32.totalorder %s27_s18, %s27_s18 }
  0x23   :  { %p3452_p0 = scmp.ne.s32.totalorder %s27_s18, %s3451_s22  ;;  %p3457_p2 = scmp.lt.s32.totalorder %s3451_s22, %s3451_s22 }
  0x25   :  { %p3458_p3 = por %p3457_p2, %p3456_p1 }
  0x27   :  { %p3459_p4 = pnand %p3458_p3, %p3452_p0 }
  0x29   :  { %3462 = shalt.err (!%p3459_p4)
}
  0x2a   :  { %32 = dma.hbm_to_vmem [thread:$0]  %s4040_s1, 256, %s27_s18, [#allocation3], %s3517_s27, %s3517_s27, %s3518_s28  }
  0x2b   :  { %s3520_s24 = smov [#allocation9]   ;;  %s3463_s30 = scalar_lea.hbm %s4042_s3, 3072 }
  0x2c   :  { %s50_s25 = sshll.u32 %s3520_s24, 4  ;;  %p3464_p5 = scmp.ne.s32.totalorder %s4042_s3, %s3463_s30  ;;  %s51_s25 = int_to_ptr.vmem [resolvable:$true] %s50_s25 }
  0x2d   :  { %p3467_p6 = scmp.lt.u32.totalorder %s3463_s30, %s4042_s3 }
  0x2f   :  { %p3469_p7 = pnand %p3467_p6, %p3464_p5 }
  0x31   :  { %3472 = shalt.err (!%p3469_p7)
}
  0x32   :  { %s3473_s9 = scalar_lea.vmem %s51_s25, 3072  ;;  %p3478_p9 = scmp.lt.s32.totalorder %s51_s25, %s51_s25 }
  0x33   :  { %p3474_p8 = scmp.ne.s32.totalorder %s51_s25, %s3473_s9  ;;  %p3479_p10 = scmp.lt.s32.totalorder %s3473_s9, %s3473_s9 }
  0x35   :  { %p3480_p11 = por %p3479_p10, %p3478_p9 }
  0x37   :  { %p3481_p12 = pnand %p3480_p11, %p3474_p8 }
  0x39   :  { %3484 = shalt.err (!%p3481_p12)
}
  0x3a   :  { %56 = dma.hbm_to_vmem [thread:$0]  %s4042_s3, 3072, %s51_s25, [#allocation8], %s3517_s27, %s3517_s27, %s3518_s28  }
  0x3b   :  { %3507 = dma.done.wait [#allocation5], 16  }
  0x3c   :  { %3508 = vsyncadd [#allocation5], 4294967280 }
  0x3d   :  { %3509 = dma.done.wait [#allocation3], 256  }
  0x3e   :  { %3510 = vsyncadd [#allocation3], 4294967040 }
  0x3f   :  { %3511 = dma.done.wait [#allocation8], 3328  }
  0x40   :  { %3512 = vsyncadd [#allocation8], 4294963968 }
  0x41   :  { %69 = sfence }
  0x42   :  { %v70_v0 = vld [vmem:[#allocation6] sm:$0xff]  ;;  %vm76_vm0 = vcmask 261120   ;;  %v71_v1 = vld [vmem:[#allocation6 + $0x8] sm:$0xff]  ;;  %v129_v16 = vld [vmem:[#allocation9 + $0x10] sm:$0xff]  ;;  %s72_s3 = sld [smem:[#allocation2]]  ;;  %s3054_s10 = sld [smem:[#allocation2 + $0x1]] }
  0x43   :  { %v77_v2 = vsel %vm76_vm0, %v70_v0, 0.0  ;;  %v80_v3 = vsel %vm76_vm0, %v71_v1, 0.0  ;;  %v127_v14 = vld [vmem:[#allocation9] sm:$0xff]  ;;  %v128_v15 = vld [vmem:[#allocation9 + $0x8] sm:$0xff]  ;;  %v130_v18 = vld [vmem:[#allocation9 + $0x18] sm:$0xff]  ;;  %s3521_s11 = smov 112  }
  0x44   :  { %78 = vadd.xlane.f32.xlu0 %v77_v2  ;;  %v3301_v17 = vpack.c.bf16 %v128_v15, %v127_v14  ;;  %v3305_v19 = vpack.c.bf16 %v130_v18, %v129_v16  ;;  %v3057_v46 = vld [vmem:[#allocation9 + $0x20] ss:$0 sm:$0xff]  ;;  %s3522_s12 = smov 120   ;;  %s3523_s13 = smov 104   ;;  %v3525_v58 = vmov 0.0   ;;  %vm3526_vm5 = vmmov 0  }
  0x45   :  { %s3524_s14 = smov 96   ;;  %3190 = vmatprep.subr.mxu0 %v3525_v58  ;;  %3192 = vmatprep.mubr.msk.f32.mxu0 %vm3526_vm5, %v3525_v58  ;;  %v3527_v62 = vmov 1983009808   ;;  %v3528_v2 = vmov 1934713408   ;;  %vm1119_vm6 = vcmask 64512  }
  0x46   :  { %3302 = vmatprep.subr.bf16.mxu1 %v3301_v17  ;;  %v242_v63 = vunpack.c.l.s4 %v3527_v62  ;;  %s3529_s2 = smov 64   ;;  %s3530_s15 = smov 16   ;;  %vm2698_vm7 = vcmask 130048   ;;  %vm2701_vm8 = vcmask 195584   ;;  %vm2949_vm13 = vcmask 523264  }
  0x47   :  { %3304 = vmatpush3.bf16.msra.mxu1 %v3301_v17  ;;  %s3531_s16 = smov 24   ;;  %s3055_s17 = sld [smem:[#allocation2 + $0x2]] }
  0x48   :  { %81 = vadd.xlane.f32.xlu0 %v80_v3  ;;  %3306 = vmatprep.subr.bf16.mxu1 %v3305_v19  ;;  %v121_v37 = vstv %s72_s3  ;;  %v124_v39 = vstv %s3054_s10  ;;  %v274_v3 = vunpack.c.l.s4 %v3528_v2  ;;  %s3056_s19 = sld [smem:[#allocation2 + $0x3]]  ;;  %s3532_s20 = smov [#allocation10]  }
  0x49   :  { %s3040_s21 = sshll.u32 %s3532_s20, 4  ;;  %s3041_s21 = int_to_ptr.vmem [resolvable:$true] %s3040_s21 }
  0x4a   :  { %s3485_s22 = scalar_lea.vmem %s3041_s21, 256  ;;  %p3490_p0 = scmp.lt.s32.totalorder %s3041_s21, %s3041_s21 }
  0x4b   :  { %3308 = vmatpush3.bf16.msra.mxu1 %v3305_v19  ;;  %p3486_p13 = scmp.ne.s32.totalorder %s3041_s21, %s3485_s22  ;;  %p3491_p1 = scmp.lt.s32.totalorder %s3485_s22, %s3485_s22 }
  0x4c   :  { %3180 = vmatprep.subr.mxu1 %v3525_v58 }
  0x4d   :  { %p3492_p2 = por %p3491_p1, %p3490_p0 }
  0x4f   :  { %p3493_p3 = pnand %p3492_p2, %p3486_p13 }
  0xd1   :  { %v79_v4 = vpop.xlane.xlu0 %78 }
  0xd2   :  { %v84_v5 = vmul.f32 0.03125, %v79_v4  ;;  %v243_v4 = vunpack.c.0.s8 %v242_v63 }
  0xd4   :  { %v86_v6 = vsub.f32 %v70_v0, %v84_v5  ;;  %v244_v0 = vlaneseq }
  0xd5   :  { %v82_v7 = vpop.xlane.xlu0 %81 }
  0xd6   :  { %v85_v8 = vmul.f32 0.03125, %v82_v7  ;;  %v88_v9 = vmul.f32 %v86_v6, %v86_v6  ;;  %v245_v5 = vshrl.u32 %v244_v0, 7 }
  0xd8   :  { %v87_v10 = vsub.f32 %v71_v1, %v85_v8  ;;  %v90_v11 = vsel %vm76_vm0, %v88_v9, 0.0 }
  0xd9   :  { %91 = vadd.xlane.f32.xlu1 %v90_v11  ;;  %v3676_v11 = vsub.s32 %v243_v4, %v245_v5 }
  0xda   :  { %v89_v12 = vmul.f32 %v87_v10, %v87_v10 }
  0xdc   :  { %v93_v13 = vsel %vm76_vm0, %v89_v12, 0.0 }
  0xdd   :  { %94 = vadd.xlane.f32.xlu1 %v93_v13 }
 0x166   :  { %v92_v20 = vpop.xlane.xlu1 %91 }
 0x167   :  { %v97_v21 = vmul.f32 0.032258064, %v92_v20 }
 0x169   :  { %3359 = vrsqrt.f32 %v97_v21  ;;  %vm101_vm1 = vcmp.eq.f32.partialorder %v97_v21, inf  ;;  %v104_v26 = vand.u32 2147483648, %v97_v21  ;;  %vm103_vm2 = vcmp.eq.f32.partialorder %v97_v21, 0.0 }
 0x16a   :  { %v95_v22 = vpop.xlane.xlu1 %94 }
 0x16b   :  { %v98_v23 = vmul.f32 0.032258064, %v95_v22 }
 0x16d   :  { %3361 = vrsqrt.f32 %v98_v23  ;;  %vm108_vm3 = vcmp.eq.f32.partialorder %v98_v23, inf  ;;  %v111_v32 = vand.u32 2147483648, %v98_v23  ;;  %vm110_vm4 = vcmp.eq.f32.partialorder %v98_v23, 0.0 }
 0x173   :  { %v3360_v24 = vpop.eup %3359 }
 0x174   :  { %v100_v25 = vmul.f32 %v3360_v24, %v97_v21 }
 0x176   :  { %v102_v27 = vsel %vm101_vm1, %v97_v21, %v100_v25 }
 0x177   :  { %v3362_v28 = vpop.eup %3361  ;;  %v105_v29 = vsel %vm103_vm2, %v104_v26, %v102_v27 }
 0x178   :  { %v107_v30 = vmul.f32 %v3362_v28, %v98_v23  ;;  %v113_v31 = vadd.f32 1e-06, %v105_v29 }
 0x17a   :  { %v109_v33 = vsel %vm108_vm3, %v98_v23, %v107_v30  ;;  %3363 = vrcp.f32 %v113_v31 }
 0x17b   :  { %v112_v34 = vsel %vm110_vm4, %v111_v32, %v109_v33 }
 0x17c   :  { %v114_v35 = vadd.f32 1e-06, %v112_v34 }
 0x17e   :  { %3365 = vrcp.f32 %v114_v35 }
 0x184   :  { %v3364_v36 = vpop.eup %3363 }
 0x185   :  { %v119_v38 = vmul.f32 %v3364_v36, %v86_v6 }
 0x187   :  { %v122_v40 = vmul.f32 %v121_v37, %v119_v38 }
 0x188   :  { %v3366_v41 = vpop.eup %3365 }
 0x189   :  { %v120_v42 = vmul.f32 %v3366_v41, %v87_v10  ;;  %v125_v43 = vadd.f32 %v124_v39, %v122_v40  ;;  %v275_v10 = vunpack.c.0.s8 %v274_v3 }
 0x18b   :  { %v123_v44 = vmul.f32 %v121_v37, %v120_v42  ;;  %3177 = vmatprep.mubr.msk.f32.mxu1 %vm76_vm0, %v125_v43  ;;  %v3680_v22 = vsub.s32 %v275_v10, %v245_v5 }
 0x18d   :  { %v126_v45 = vadd.f32 %v124_v39, %v123_v44 }
 0x18f   :  { %3178 = vmatmul.mubr.msk.f32.vlgmr.msra.gmra.mrb[0].mxu1 %vm76_vm0, %v126_v45 }
 0x190   :  { %3182 = vmatprep.mubr.msk.f32.mxu1 %vm3526_vm5, %v3525_v58 }
 0x262   :  { %v3179_v47 = vpop.f32.mrb[0].mxu1 }
 0x263   :  { %v208_v48 = vpop.f32.mrb[1].mxu1  ;;  %v3627_v50 = vadd.f32 %v3179_v47, %v3057_v46 }
 0x264   :  { %v3621_v49 = vadd.f32 %v3057_v46, %v208_v48 }
 0x265   :  { %v3664_v59 = vmul.f32 0.35355338, %v3627_v50 }
 0x266   :  { %517 = vrot.lane.b32.xlu1 %v3621_v49, %s3521_s11  ;;  %513 = vrot.lane.b32.xlu0 %v3621_v49, %s3522_s12  ;;  %v217_v51 = vmul.f32 0.35355338, %v3621_v49 }
 0x26a   :  { %521 = vrot.lane.b32.xlu1 %v3621_v49, %s3523_s13  ;;  %519 = vrot.lane.b32.xlu0 %v3627_v50, %s3521_s11 }
 0x26e   :  { %515 = vrot.lane.b32.xlu1 %v3627_v50, %s3522_s12  ;;  %525 = vrot.lane.b32.xlu0 %v3621_v49, %s3524_s14 }
 0x272   :  { %523 = vrot.lane.b32.xlu1 %v3627_v50, %s3523_s13  ;;  %221 = vrot.lane.b32.xlu0 %v217_v51, %s3522_s12 }
 0x276   :  { %227 = vrot.lane.b32.xlu1 %v217_v51, %s3521_s11 }
 0x2d8   :  { %v3641_v52 = vpop.permute.xlu1 %517  ;;  %v3643_v53 = vpop.permute.xlu0 %513 }
 0x2d9   :  { %529 = vrot.lane.b32.xlu1 %v3643_v53, %s3524_s14  ;;  %533 = vrot.lane.b32.xlu0 %v3641_v52, %s3524_s14 }
 0x2dc   :  { %v3647_v54 = vpop.permute.xlu1 %521  ;;  %v3655_v56 = vpop.permute.xlu0 %519 }
 0x2dd   :  { %537 = vrot.lane.b32.xlu1 %v3647_v54, %s3524_s14  ;;  %233 = vrot.lane.b32.xlu0 %v217_v51, %s3523_s13 }
 0x2e0   :  { %v3651_v55 = vpop.permute.xlu1 %515  ;;  %v526_v60 = vpop.permute.xlu0 %525 }
 0x2e1   :  { %527 = vrot.lane.b32.xlu1 %v3627_v50, %s3524_s14  ;;  %531 = vrot.lane.b32.xlu0 %v3651_v55, %s3524_s14 }
 0x2e4   :  { %v3657_v57 = vpop.permute.xlu1 %523  ;;  %v222_v61 = vpop.permute.xlu0 %221 }
 0x2e5   :  { %535 = vrot.lane.b32.xlu1 %v3655_v56, %s3524_s14  ;;  %539 = vrot.lane.b32.xlu0 %v3657_v57, %s3524_s14 }
 0x2e8   :  { %v228_v1 = vpop.permute.xlu1 %227 }
 0x2e9   :  { %223 = vrot.lane.b32.xlu1 %v3664_v59, %s3522_s12  ;;  %229 = vrot.lane.b32.xlu0 %v3664_v59, %s3521_s11  ;;  %v239_v12 = vcombine.low %v217_v51, %v228_v1  ;;  %v240_v13 = vcombine.high %v217_v51, %v228_v1 }
 0x2eb   :  { %v247_v27 = vrot.slane %v239_v12, %v3676_v11  ;;  %v254_v28 = vrot.slane %v240_v13, %v3676_v11 }
 0x2ed   :  { %235 = vrot.lane.b32.xlu1 %v3664_v59, %s3523_s13 }
 0x34b   :  { %v530_v6 = vpop.permute.xlu1 %529  ;;  %v534_v7 = vpop.permute.xlu0 %533 }
 0x34c   :  { %v549_v8 = vcombine.low %v526_v60, %v534_v7  ;;  %v550_v9 = vcombine.high %v526_v60, %v534_v7 }
 0x34e   :  { %v557_v20 = vrot.slane %v549_v8, %v3676_v11  ;;  %v564_v21 = vrot.slane %v550_v9, %v3676_v11 }
 0x34f   :  { %v538_v14 = vpop.permute.xlu1 %537  ;;  %v234_v15 = vpop.permute.xlu0 %233 }
 0x350   :  { %v565_v16 = vcombine.low %v530_v6, %v538_v14  ;;  %v566_v17 = vcombine.high %v530_v6, %v538_v14  ;;  %v255_v18 = vcombine.low %v222_v61, %v234_v15  ;;  %v256_v19 = vcombine.high %v222_v61, %v234_v15 }
 0x352   :  { %v573_v23 = vrot.slane %v565_v16, %v3676_v11  ;;  %v580_v24 = vrot.slane %v566_v17, %v3676_v11  ;;  %v263_v25 = vrot.slane %v255_v18, %v3676_v11  ;;  %v270_v26 = vrot.slane %v256_v19, %v3676_v11 }
 0x353   :  { %v528_v29 = vpop.permute.xlu1 %527  ;;  %v532_v30 = vpop.permute.xlu0 %531 }
 0x354   :  { %v581_v31 = vcombine.low %v557_v20, %v573_v23  ;;  %v582_v32 = vcombine.high %v557_v20, %v573_v23  ;;  %v597_v33 = vcombine.low %v564_v21, %v580_v24  ;;  %v598_v34 = vcombine.high %v564_v21, %v580_v24 }
 0x355   :  { %v271_v35 = vcombine.low %v247_v27, %v263_v25  ;;  %v272_v36 = vcombine.high %v247_v27, %v263_v25  ;;  %v287_v37 = vcombine.low %v254_v28, %v270_v26  ;;  %v288_v38 = vcombine.high %v254_v28, %v270_v26 }
 0x356   :  { %v589_v39 = vrot.slane %v581_v31, %v3680_v22  ;;  %v596_v40 = vrot.slane %v582_v32, %v3680_v22  ;;  %v605_v41 = vrot.slane %v597_v33, %v3680_v22  ;;  %v612_v42 = vrot.slane %v598_v34, %v3680_v22 }
 0x357   :  { %v279_v43 = vrot.slane %v271_v35, %v3680_v22  ;;  %v286_v44 = vrot.slane %v272_v36, %v3680_v22  ;;  %v295_v45 = vrot.slane %v287_v37, %v3680_v22  ;;  %v302_v46 = vrot.slane %v288_v38, %v3680_v22  ;;  %v536_v47 = vpop.permute.xlu1 %535  ;;  %v540_v48 = vpop.permute.xlu0 %539 }
 0x358   :  { %v685_v51 = vcombine.low %v589_v39, %v596_v40  ;;  %v3064_v60 = vcombine.high %v589_v39, %v596_v40  ;;  %v701_v61 = vcombine.low %v605_v41, %v612_v42  ;;  %v3065_v62 = vcombine.high %v605_v41, %v612_v42 }
 0x359   :  { %v375_v63 = vcombine.low %v279_v43, %v286_v44  ;;  %v3060_v0 = vcombine.high %v279_v43, %v286_v44  ;;  %v391_v1 = vcombine.low %v295_v45, %v302_v46  ;;  %v3061_v2 = vcombine.high %v295_v45, %v302_v46 }
 0x35a   :  { %v3697_v3 = vrot.slane %v685_v51, %v3676_v11  ;;  %v3700_v4 = vrot.slane %v3064_v60, %v3676_v11  ;;  %v3703_v5 = vrot.slane %v701_v61, %v3676_v11  ;;  %v3706_v6 = vrot.slane %v3065_v62, %v3676_v11 }
 0x35b   :  { %v3709_v7 = vrot.slane %v375_v63, %v3676_v11  ;;  %v3712_v8 = vrot.slane %v3060_v0, %v3676_v11  ;;  %v3715_v9 = vrot.slane %v391_v1, %v3676_v11  ;;  %v3718_v10 = vrot.slane %v3061_v2, %v3676_v11  ;;  %v224_v12 = vpop.permute.xlu1 %223  ;;  %v230_v13 = vpop.permute.xlu0 %229 }
 0x35c   :  { %v717_v14 = vcombine.low %v3697_v3, %v3700_v4  ;;  %v733_v15 = vcombine.low %v3703_v5, %v3706_v6  ;;  %v617_v16 = vcombine.low %v528_v29, %v536_v47  ;;  %v618_v17 = vcombine.high %v528_v29, %v536_v47 }
 0x35d   :  { %v407_v18 = vcombine.low %v3709_v7, %v3712_v8  ;;  %v423_v19 = vcombine.low %v3715_v9, %v3718_v10  ;;  %v633_v20 = vcombine.low %v532_v30, %v540_v48  ;;  %v634_v21 = vcombine.high %v532_v30, %v540_v48 }
 0x35e   :  { %v625_v23 = vrot.slane %v617_v16, %v3676_v11  ;;  %v632_v24 = vrot.slane %v618_v17, %v3676_v11  ;;  %v307_v25 = vcombine.low %v3664_v59, %v230_v13  ;;  %v308_v26 = vcombine.high %v3664_v59, %v230_v13 }
 0x35f   :  { %v641_v27 = vrot.slane %v633_v20, %v3676_v11  ;;  %v648_v28 = vrot.slane %v634_v21, %v3676_v11  ;;  %v236_v29 = vpop.permute.xlu1 %235  ;;  %v3735_v31 = vrot.slane %v717_v14, %v3680_v22  ;;  %v3738_v32 = vrot.slane %v733_v15, %v3680_v22 }
 0x360   :  { %v315_v30 = vrot.slane %v307_v25, %v3676_v11  ;;  %v322_v33 = vrot.slane %v308_v26, %v3676_v11  ;;  %v323_v34 = vcombine.low %v224_v12, %v236_v29  ;;  %v324_v35 = vcombine.high %v224_v12, %v236_v29 }
 0x361   :  { %v649_v36 = vcombine.low %v625_v23, %v641_v27  ;;  %v650_v37 = vcombine.high %v625_v23, %v641_v27  ;;  %v665_v59 = vcombine.low %v632_v24, %v648_v28  ;;  %v666_v38 = vcombine.high %v632_v24, %v648_v28 }
 0x362   :  { %v331_v39 = vrot.slane %v323_v34, %v3676_v11  ;;  %v338_v40 = vrot.slane %v324_v35, %v3676_v11  ;;  %v749_v41 = vcombine.low %v3735_v31, %v3738_v32  ;;  %v718_v42 = vcombine.high %v3697_v3, %v3700_v4 }
 0x363   :  { %v657_v43 = vrot.slane %v649_v36, %v3680_v22  ;;  %v664_v44 = vrot.slane %v650_v37, %v3680_v22  ;;  %v673_v45 = vrot.slane %v665_v59, %v3680_v22  ;;  %v680_v46 = vrot.slane %v666_v38, %v3680_v22 }
 0x364   :  { %v339_v47 = vcombine.low %v315_v30, %v331_v39  ;;  %v340_v48 = vcombine.high %v315_v30, %v331_v39  ;;  %v355_v51 = vcombine.low %v322_v33, %v338_v40  ;;  %v356_v60 = vcombine.high %v322_v33, %v338_v40  ;;  %3181 = vmatpush3.xpose.msk.msra.mxu1 %vm1119_vm6, %v749_v41 }
 0x365   :  { %v753_v61 = vcombine.low %v657_v43, %v664_v44  ;;  %v3066_v62 = vcombine.high %v657_v43, %v664_v44  ;;  %v769_v63 = vcombine.low %v673_v45, %v680_v46  ;;  %v3067_v0 = vcombine.high %v673_v45, %v680_v46  ;;  %3185 = vmatprep.subr.mxu1 %v3525_v58 }
 0x366   :  { %v347_v1 = vrot.slane %v339_v47, %v3680_v22  ;;  %v354_v2 = vrot.slane %v340_v48, %v3680_v22  ;;  %v363_v3 = vrot.slane %v355_v51, %v3680_v22  ;;  %v370_v4 = vrot.slane %v356_v60, %v3680_v22 }
 0x367   :  { %v760_v12 = vrot.slane %v753_v61, %v3676_v11  ;;  %v768_v13 = vrot.slane %v3066_v62, %v3676_v11  ;;  %v776_v14 = vrot.slane %v769_v63, %v3676_v11  ;;  %v784_v15 = vrot.slane %v3067_v0, %v3676_v11 }
 0x368   :  { %v443_v16 = vcombine.low %v347_v1, %v354_v2  ;;  %v3062_v17 = vcombine.high %v347_v1, %v354_v2  ;;  %v459_v20 = vcombine.low %v363_v3, %v370_v4  ;;  %v3063_v21 = vcombine.high %v363_v3, %v370_v4  ;;  %v1117_v4 = vld [vmem:[#allocation7] sm:$0xff] }
 0x369   :  { %v785_v23 = vcombine.low %v760_v12, %v768_v13  ;;  %v801_v24 = vcombine.low %v776_v14, %v784_v15  ;;  %v732_v29 = vrot.slane %v718_v42, %v3680_v22  ;;  %v734_v30 = vcombine.high %v3703_v5, %v3706_v6 }
 0x36a   :  { %v450_v25 = vrot.slane %v443_v16, %v3676_v11  ;;  %v458_v26 = vrot.slane %v3062_v17, %v3676_v11  ;;  %v466_v27 = vrot.slane %v459_v20, %v3676_v11  ;;  %v474_v28 = vrot.slane %v3063_v21, %v3676_v11 }
 0x36b   :  { %v415_v33 = vrot.slane %v407_v18, %v3680_v22  ;;  %v431_v34 = vrot.slane %v423_v19, %v3680_v22  ;;  %v748_v37 = vrot.slane %v734_v30, %v3680_v22  ;;  %v408_v38 = vcombine.high %v3709_v7, %v3712_v8 }
 0x36c   :  { %v475_v35 = vcombine.low %v450_v25, %v458_v26  ;;  %v491_v36 = vcombine.low %v466_v27, %v474_v28  ;;  %v424_v39 = vcombine.high %v3715_v9, %v3718_v10  ;;  %v750_v40 = vcombine.high %v3735_v31, %v3738_v32 }
 0x36d   :  { %v439_v59 = vcombine.low %v415_v33, %v431_v34  ;;  %v793_v5 = vrot.slane %v785_v23, %v3680_v22  ;;  %v809_v6 = vrot.slane %v801_v24, %v3680_v22  ;;  %v751_v18 = vcombine.low %v732_v29, %v748_v37 }
 0x36e   :  { %v422_v19 = vrot.slane %v408_v38, %v3680_v22  ;;  %v438_v41 = vrot.slane %v424_v39, %v3680_v22  ;;  %v786_v42 = vcombine.high %v760_v12, %v768_v13  ;;  %v802_v43 = vcombine.high %v776_v14, %v784_v15 }
 0x36f   :  { %3183 = vmatmul.mubr.msk.f32.vlgmr.msra.gmra.mrb[2].mxu1 %vm1119_vm6, %v439_v59  ;;  %v440_v7 = vcombine.high %v415_v33, %v431_v34  ;;  %3191 = vmatpush3.xpose.msk.msra.mxu0 %vm1119_vm6, %v751_v18  ;;  %v817_v8 = vcombine.low %v793_v5, %v809_v6  ;;  %v483_v9 = vrot.slane %v475_v35, %v3680_v22 }
 0x370   :  { %3186 = vmatpush3.xpose.msk.msra.mxu1 %vm1119_vm6, %v750_v40  ;;  %3187 = vmatprep.mubr.msk.f32.mxu1 %vm3526_vm5, %v3525_v58  ;;  %v499_v10 = vrot.slane %v491_v36, %v3680_v22  ;;  %v752_v31 = vcombine.high %v732_v29, %v748_v37  ;;  %v441_v32 = vcombine.low %v422_v19, %v438_v41 }
 0x371   :  { %3195 = vmatprep.subr.mxu1 %v3525_v58  ;;  %3200 = vmatprep.subr.mxu0 %v3525_v58  ;;  %v476_v44 = vcombine.high %v450_v25, %v458_v26  ;;  %v492_v45 = vcombine.high %v466_v27, %v474_v28  ;;  %v800_v46 = vrot.slane %v786_v42, %v3680_v22  ;;  %v1118_v28 = vld [vmem:[#allocation7 + $0x8] sm:$0xff] }
 0x372   :  { %3193 = vmatmul.mubr.msk.f32.vlgmr.msra.gmra.mrb[0].mxu0 %vm1119_vm6, %v441_v32  ;;  %v816_v47 = vrot.slane %v802_v43, %v3680_v22  ;;  %v442_v48 = vcombine.high %v422_v19, %v438_v41  ;;  %v507_v51 = vcombine.low %v483_v9, %v499_v10  ;;  %v818_v60 = vcombine.high %v793_v5, %v809_v6 }
 0x373   :  { %3188 = vmatmul.mubr.msk.f32.vlgmr.msra.gmra.mrb[4].mxu1 %vm1119_vm6, %v440_v7  ;;  %3201 = vmatpush3.xpose.msk.msra.mxu0 %vm1119_vm6, %v817_v8  ;;  %v508_v61 = vcombine.high %v483_v9, %v499_v10  ;;  %v490_v62 = vrot.slane %v476_v44, %v3680_v22  ;;  %v506_v63 = vrot.slane %v492_v45, %v3680_v22 }
 0x374   :  { %3196 = vmatpush3.xpose.msk.msra.mxu1 %vm1119_vm6, %v752_v31  ;;  %3197 = vmatprep.mubr.msk.f32.mxu1 %vm3526_vm5, %v3525_v58  ;;  %v819_v0 = vcombine.low %v800_v46, %v816_v47  ;;  %v820_v1 = vcombine.high %v800_v46, %v816_v47 }
 0x375   :  { %3205 = vmatprep.subr.mxu1 %v3525_v58  ;;  %3202 = vmatprep.mubr.msk.f32.mxu0 %vm3526_vm5, %v3525_v58  ;;  %v509_v2 = vcombine.low %v490_v62, %v506_v63  ;;  %v510_v3 = vcombine.high %v490_v62, %v506_v63 }
 0x376   :  { %3210 = vmatprep.subr.mxu0 %v3525_v58  ;;  %3203 = vmatmul.mubr.msk.f32.vlgmr.msra.gmra.mrb[2].mxu0 %vm1119_vm6, %v507_v51 }
 0x377   :  { %3198 = vmatmul.mubr.msk.f32.vlgmr.msra.gmra.mrb[6].mxu1 %vm1119_vm6, %v442_v48  ;;  %3211 = vmatpush3.xpose.msk.msra.mxu0 %vm1119_vm6, %v819_v0 }
 0x378   :  { %3206 = vmatpush3.xpose.msk.msra.mxu1 %vm1119_vm6, %v818_v60  ;;  %3207 = vmatprep.mubr.msk.f32.mxu1 %vm3526_vm5, %v3525_v58 }
 0x379   :  { %3215 = vmatprep.subr.mxu1 %v3525_v58  ;;  %3212 = vmatprep.mubr.msk.f32.mxu0 %vm3526_vm5, %v3525_v58 }
 0x37a   :  { %3220 = vmatprep.subr.mxu0 %v3525_v58  ;;  %3213 = vmatmul.mubr.msk.f32.vlgmr.msra.gmra.mrb[4].mxu0 %vm1119_vm6, %v509_v2 }
 0x37b   :  { %3208 = vmatmul.mubr.msk.f32.vlgmr.msra.gmra.mrb[8].mxu1 %vm1119_vm6, %v508_v61  ;;  %3222 = vmatprep.mubr.msk.f32.mxu0 %vm3526_vm5, %v3525_v58 }
 0x37c   :  { %3216 = vmatpush3.xpose.msk.msra.mxu1 %vm1119_vm6, %v820_v1  ;;  %3217 = vmatprep.mubr.msk.f32.mxu1 %vm3526_vm5, %v3525_v58 }
 0x37d   :  { %3225 = vmatprep.subr.mxu1 %v3525_v58 }
 0x37f   :  { %3218 = vmatmul.mubr.msk.f32.vlgmr.msra.gmra.mrb[10].mxu1 %vm1119_vm6, %v510_v3 }
 0x380   :  { %3227 = vmatprep.mubr.msk.f32.mxu1 %vm3526_vm5, %v3525_v58 }
 0x442   :  { %v1192_v12 = vpop.f32.mrb[2].mxu1 }
 0x443   :  { %v1193_v13 = vadd.f32 %v1192_v12, %v1117_v4  ;;  %v3184_v14 = vpop.f32.mrb[3].mxu1 }
 0x445   :  { %v1728_v15 = vsel %vm1119_vm6, %v1193_v13, -inf  ;;  %v1344_v17 = vpop.f32.mrb[0].mxu0 }
 0x446   :  { %1729 = vmax.xlane.f32.xlu0 %v1728_v15  ;;  %v1268_v16 = vpop.f32.mrb[4].mxu1  ;;  %v1345_v23 = vadd.f32 %v1344_v17, %v1117_v4  ;;  %v3194_v24 = vpop.f32.mrb[1].mxu0 }
 0x447   :  { %v1269_v20 = vadd.f32 %v1268_v16, %v1117_v4  ;;  %v3189_v21 = vpop.f32.mrb[5].mxu1 }
 0x448   :  { %v1734_v26 = vsel %vm1119_vm6, %v1345_v23, -inf }
 0x449   :  { %v1731_v25 = vsel %vm1119_vm6, %v1269_v20, -inf  ;;  %v1496_v30 = vpop.f32.mrb[2].mxu0 }
 0x44a   :  { %1732 = vmax.xlane.f32.xlu1 %v1731_v25  ;;  %v1420_v27 = vpop.f32.mrb[6].mxu1  ;;  %1735 = vmax.xlane.f32.xlu0 %v1734_v26  ;;  %v1497_v33 = vadd.f32 %v1496_v30, %v1118_v28  ;;  %v3204_v34 = vpop.f32.mrb[3].mxu0 }
 0x44b   :  { %v3199_v29 = vpop.f32.mrb[7].mxu1  ;;  %v1421_v36 = vadd.f32 %v1420_v27, %v1117_v4 }
 0x44c   :  { %v1740_v59 = vsel %vm1119_vm6, %v1497_v33, -inf }
 0x44d   :  { %v1648_v38 = vpop.f32.mrb[4].mxu0  ;;  %v1737_v18 = vsel %vm1119_vm6, %v1421_v36, -inf }
 0x44e   :  { %v1572_v35 = vpop.f32.mrb[8].mxu1  ;;  %1741 = vmax.xlane.f32.xlu0 %v1740_v59  ;;  %v3214_v39 = vpop.f32.mrb[5].mxu0  ;;  %v1649_v5 = vadd.f32 %v1648_v38, %v1118_v28 }
 0x44f   :  { %v3209_v37 = vpop.f32.mrb[9].mxu1  ;;  %v1573_v41 = vadd.f32 %v1572_v35, %v1118_v28 }
 0x450   :  { %v1746_v19 = vsel %vm1119_vm6, %v1649_v5, -inf }
 0x451   :  { %v1743_v43 = vsel %vm1119_vm6, %v1573_v41, -inf }
 0x452   :  { %v1724_v40 = vpop.f32.mrb[10].mxu1  ;;  %1738 = vmax.xlane.f32.xlu0 %v1737_v18 }
 0x453   :  { %v3219_v6 = vpop.f32.mrb[11].mxu1  ;;  %v1725_v42 = vadd.f32 %v1724_v40, %v1118_v28 }
 0x455   :  { %v1749_v7 = vsel %vm1119_vm6, %v1725_v42, -inf }
 0x456   :  { %1747 = vmax.xlane.f32.xlu0 %v1746_v19 }
 0x45b   :  { %825 = vrot.lane.b32.xlu1 %v3643_v53, %s3529_s2 }
 0x45f   :  { %829 = vrot.lane.b32.xlu1 %v3641_v52, %s3529_s2 }
 0x46c   :  { %821 = vrot.lane.b32.xlu0 %v3621_v49, %s3529_s2 }
 0x483   :  { %1744 = vmax.xlane.f32.xlu1 %v1743_v43 }
 0x487   :  { %1750 = vmax.xlane.f32.xlu1 %v1749_v7 }
 0x498   :  { %833 = vrot.lane.b32.xlu1 %v3647_v54, %s3529_s2 }
 0x4d3   :  { %v1730_v8 = vpop.xlane.xlu0 %1729 }
 0x4d4   :  { %v1752_v9 = vsub.f32 %v1193_v13, %v1730_v8 }
 0x4d6   :  { %v1760_v53 = vmul.f32 1.442695, %v1752_v9 }
 0x4d7   :  { %v1733_v10 = vpop.xlane.xlu1 %1732  ;;  %v1736_v31 = vpop.xlane.xlu0 %1735 }
 0x4d8   :  { %3367 = vpow2.f32 %v1760_v53  ;;  %v1753_v52 = vsub.f32 %v1269_v20, %v1733_v10  ;;  %v1754_v32 = vsub.f32 %v1345_v23, %v1736_v31 }
 0x4da   :  { %v1762_v49 = vmul.f32 1.442695, %v1753_v52  ;;  %v1764_v44 = vmul.f32 1.442695, %v1754_v32 }
 0x4db   :  { %v1742_v45 = vpop.xlane.xlu0 %1741  ;;  %v826_v20 = vpop.permute.xlu1 %825 }
 0x4dc   :  { %3369 = vpow2.f32 %v1762_v49  ;;  %v1756_v46 = vsub.f32 %v1497_v33, %v1742_v45 }
 0x4dd   :  { %3371 = vpow2.f32 %v1764_v44 }
 0x4de   :  { %v1768_v47 = vmul.f32 1.442695, %v1756_v46 }
 0x4df   :  { %v1739_v48 = vpop.xlane.xlu0 %1738  ;;  %v830_v21 = vpop.permute.xlu1 %829 }
 0x4e0   :  { %3373 = vpow2.f32 %v1768_v47  ;;  %v1755_v54 = vsub.f32 %v1421_v36, %v1739_v48 }
 0x4e2   :  { %v3842_v51 = vpop.eup %3367  ;;  %v1766_v61 = vmul.f32 1.442695, %v1755_v54 }
 0x4e3   :  { %v1776_v60 = vsel %vm1119_vm6, %v3842_v51, 0.0  ;;  %v1748_v62 = vpop.xlane.xlu0 %1747 }
 0x4e4   :  { %1777 = vadd.xlane.f32.xlu0 %v1776_v60  ;;  %3375 = vpow2.f32 %v1766_v61  ;;  %v1758_v0 = vsub.f32 %v1649_v5, %v1748_v62 }
 0x4e6   :  { %v3846_v63 = vpop.eup %3369  ;;  %v1772_v4 = vmul.f32 1.442695, %v1758_v0 }
 0x4e7   :  { %v3848_v1 = vpop.eup %3371  ;;  %v1779_v2 = vsel %vm1119_vm6, %v3846_v63, 0.0  ;;  %v822_v26 = vpop.permute.xlu0 %821 }
 0x4e8   :  { %1780 = vadd.xlane.f32.xlu1 %v1779_v2  ;;  %v1782_v3 = vsel %vm1119_vm6, %v3848_v1, 0.0  ;;  %3377 = vpow2.f32 %v1772_v4  ;;  %v845_v29 = vcombine.low %v822_v26, %v830_v21  ;;  %v846_v30 = vcombine.high %v822_v26, %v830_v21 }
 0x4e9   :  { %1783 = vadd.xlane.f32.xlu0 %v1782_v3 }
 0x4ea   :  { %v3854_v12 = vpop.eup %3373  ;;  %v853_v37 = vrot.slane %v845_v29, %v3676_v11  ;;  %v860_v59 = vrot.slane %v846_v30, %v3676_v11 }
 0x4eb   :  { %v1788_v13 = vsel %vm1119_vm6, %v3854_v12, 0.0 }
 0x4ed   :  { %1789 = vadd.xlane.f32.xlu0 %v1788_v13 }
 0x4ee   :  { %v3858_v14 = vpop.eup %3375 }
 0x4ef   :  { %v1785_v15 = vsel %vm1119_vm6, %v3858_v14, 0.0 }
 0x4f0   :  { %1786 = vadd.xlane.f32.xlu1 %v1785_v15 }
 0x4f2   :  { %v3862_v16 = vpop.eup %3377 }
 0x4f3   :  { %v1794_v17 = vsel %vm1119_vm6, %v3862_v16, 0.0 }
 0x4f4   :  { %1795 = vadd.xlane.f32.xlu0 %v1794_v17 }
 0x510   :  { %v1745_v23 = vpop.xlane.xlu1 %1744 }
 0x511   :  { %v1757_v24 = vsub.f32 %v1573_v41, %v1745_v23 }
 0x513   :  { %v1770_v25 = vmul.f32 1.442695, %v1757_v24 }
 0x514   :  { %v1751_v27 = vpop.xlane.xlu1 %1750 }
 0x515   :  { %3379 = vpow2.f32 %v1770_v25  ;;  %v1759_v28 = vsub.f32 %v1725_v42, %v1751_v27 }
 0x517   :  { %v1774_v33 = vmul.f32 1.442695, %v1759_v28 }
 0x518   :  { %v834_v34 = vpop.permute.xlu1 %833 }
 0x519   :  { %3381 = vpow2.f32 %v1774_v33  ;;  %v861_v35 = vcombine.low %v826_v20, %v834_v34  ;;  %v862_v36 = vcombine.high %v826_v20, %v834_v34 }
 0x51b   :  { %v869_v38 = vrot.slane %v861_v35, %v3676_v11  ;;  %v876_v39 = vrot.slane %v862_v36, %v3676_v11 }
 0x51d   :  { %v877_v40 = vcombine.low %v853_v37, %v869_v38  ;;  %v878_v5 = vcombine.high %v853_v37, %v869_v38  ;;  %v893_v6 = vcombine.low %v860_v59, %v876_v39  ;;  %v894_v18 = vcombine.high %v860_v59, %v876_v39 }
 0x51f   :  { %v3870_v19 = vpop.eup %3379  ;;  %v885_v41 = vrot.slane %v877_v40, %v3680_v22  ;;  %v892_v42 = vrot.slane %v878_v5, %v3680_v22  ;;  %v901_v43 = vrot.slane %v893_v6, %v3680_v22  ;;  %v908_v7 = vrot.slane %v894_v18, %v3680_v22 }
 0x520   :  { %v1791_v8 = vsel %vm1119_vm6, %v3870_v19, 0.0 }
 0x521   :  { %v981_v9 = vcombine.low %v885_v41, %v892_v42  ;;  %v3068_v53 = vcombine.high %v885_v41, %v892_v42  ;;  %v997_v10 = vcombine.low %v901_v43, %v908_v7  ;;  %v3069_v52 = vcombine.high %v901_v43, %v908_v7  ;;  %1792 = vadd.xlane.f32.xlu1 %v1791_v8 }
 0x523   :  { %v3878_v31 = vpop.eup %3381  ;;  %v988_v32 = vrot.slane %v981_v9, %v3676_v11  ;;  %v996_v49 = vrot.slane %v3068_v53, %v3676_v11  ;;  %v1004_v44 = vrot.slane %v997_v10, %v3676_v11  ;;  %v1012_v45 = vrot.slane %v3069_v52, %v3676_v11 }
 0x524   :  { %v1797_v46 = vsel %vm1119_vm6, %v3878_v31, 0.0 }
 0x525   :  { %1798 = vadd.xlane.f32.xlu0 %v1797_v46  ;;  %v1013_v47 = vcombine.low %v988_v32, %v996_v49  ;;  %v1029_v48 = vcombine.low %v1004_v44, %v1012_v45  ;;  %v1014_v54 = vcombine.high %v988_v32, %v996_v49  ;;  %v1030_v60 = vcombine.high %v1004_v44, %v1012_v45 }
 0x527   :  { %v1021_v61 = vrot.slane %v1013_v47, %v3680_v22  ;;  %v1037_v62 = vrot.slane %v1029_v48, %v3680_v22  ;;  %v1028_v0 = vrot.slane %v1014_v54, %v3680_v22  ;;  %v1044_v2 = vrot.slane %v1030_v60, %v3680_v22 }
 0x529   :  { %v1045_v3 = vcombine.low %v1021_v61, %v1037_v62  ;;  %v1046_v4 = vcombine.high %v1021_v61, %v1037_v62  ;;  %v1047_v13 = vcombine.low %v1028_v0, %v1044_v2  ;;  %v1048_v15 = vcombine.high %v1028_v0, %v1044_v2 }
 0x52b   :  { %3221 = vmatpush3.msra.mxu0 %v1045_v3  ;;  %3226 = vmatpush3.msra.mxu1 %v1046_v4 }
 0x52c   :  { %3230 = vmatprep.subr.mxu0 %v3525_v58  ;;  %3235 = vmatprep.subr.mxu1 %v3525_v58 }
 0x532   :  { %827 = vrot.lane.b32.xlu1 %v3651_v55, %s3529_s2 }
 0x536   :  { %831 = vrot.lane.b32.xlu1 %v3655_v56, %s3529_s2 }
 0x53a   :  { %835 = vrot.lane.b32.xlu1 %v3657_v57, %s3529_s2 }
 0x53b   :  { %823 = vrot.lane.b32.xlu0 %v3627_v50, %s3529_s2 }
 0x571   :  { %v1778_v17 = vpop.xlane.xlu0 %1777 }
 0x572   :  { %3383 = vrcp.f32 %v1778_v17 }
 0x575   :  { %v1781_v20 = vpop.xlane.xlu1 %1780 }
 0x576   :  { %3385 = vrcp.f32 %v1781_v20  ;;  %v1784_v21 = vpop.xlane.xlu0 %1783 }
 0x577   :  { %3387 = vrcp.f32 %v1784_v21 }
 0x57c   :  { %v3384_v23 = vpop.eup %3383 }
 0x57d   :  { %v1801_v24 = vmul.f32 %v3384_v23, %v3842_v51  ;;  %v1787_v55 = vpop.xlane.xlu1 %1786 }
 0x57e   :  { %3389 = vrcp.f32 %v1787_v55 }
 0x57f   :  { %3223 = vmatmul.mubr.msk.f32.vlgmr.msra.gmra.mrb[6].mxu0 %vm1119_vm6, %v1801_v24 }
 0x580   :  { %v3386_v25 = vpop.eup %3385  ;;  %3231 = vmatpush3.msra.mxu0 %v1047_v13  ;;  %3232 = vmatprep.mubr.msk.f32.mxu0 %vm3526_vm5, %v3525_v58 }
 0x581   :  { %v3388_v56 = vpop.eup %3387  ;;  %v1803_v50 = vmul.f32 %v3386_v25, %v3846_v63  ;;  %3240 = vmatprep.subr.mxu0 %v3525_v58 }
 0x582   :  { %v1805_v57 = vmul.f32 %v3388_v56, %v3848_v1  ;;  %v1790_v1 = vpop.xlane.xlu0 %1789 }
 0x583   :  { %3228 = vmatmul.mubr.msk.f32.vlgmr.msra.gmra.mrb[12].mxu1 %vm1119_vm6, %v1803_v50  ;;  %3391 = vrcp.f32 %v1790_v1 }
 0x584   :  { %3233 = vmatmul.mubr.msk.f32.vlgmr.msra.gmra.mrb[8].mxu0 %vm1119_vm6, %v1805_v57  ;;  %3236 = vmatpush3.msra.mxu1 %v1048_v15 }
 0x585   :  { %3237 = vmatprep.mubr.msk.f32.mxu1 %vm3526_vm5, %v3525_v58  ;;  %3245 = vmatprep.subr.mxu1 %v3525_v58 }
 0x586   :  { %3242 = vmatprep.mubr.msk.f32.mxu0 %vm3526_vm5, %v3525_v58  ;;  %v1796_v26 = vpop.xlane.xlu0 %1795 }
 0x588   :  { %v3390_v51 = vpop.eup %3389 }
 0x589   :  { %v1807_v63 = vmul.f32 %v3390_v51, %v3858_v14 }
 0x58b   :  { %3238 = vmatmul.mubr.msk.f32.vlgmr.msra.gmra.mrb[14].mxu1 %vm1119_vm6, %v1807_v63 }
 0x58c   :  { %3247 = vmatprep.mubr.msk.f32.mxu1 %vm3526_vm5, %v3525_v58 }
 0x58d   :  { %v3392_v46 = vpop.eup %3391 }
 0x58e   :  { %v1809_v20 = vmul.f32 %v3392_v46, %v3854_v12 }
 0x5ae   :  { %v1793_v27 = vpop.xlane.xlu1 %1792 }
 0x5af   :  { %3393 = vrcp.f32 %v1793_v27 }
 0x5b0   :  { %3395 = vrcp.f32 %v1796_v26 }
 0x5b2   :  { %v828_v28 = vpop.permute.xlu1 %827  ;;  %v1799_v29 = vpop.xlane.xlu0 %1798 }
 0x5b3   :  { %3397 = vrcp.f32 %v1799_v29 }
 0x5b6   :  { %v832_v30 = vpop.permute.xlu1 %831  ;;  %v824_v33 = vpop.permute.xlu0 %823 }
 0x5b7   :  { %v913_v34 = vcombine.low %v824_v33, %v832_v30  ;;  %v914_v35 = vcombine.high %v824_v33, %v832_v30 }
 0x5b9   :  { %v921_v14 = vrot.slane %v913_v34, %v3676_v11  ;;  %v928_v38 = vrot.slane %v914_v35, %v3676_v11  ;;  %v3394_v61 = vpop.eup %3393 }
 0x5ba   :  { %v836_v36 = vpop.permute.xlu1 %835  ;;  %v3396_v2 = vpop.eup %3395  ;;  %v1811_v21 = vmul.f32 %v3394_v61, %v3870_v19 }
 0x5bb   :  { %v929_v37 = vcombine.low %v828_v28, %v836_v36  ;;  %v930_v59 = vcombine.high %v828_v28, %v836_v36  ;;  %v1813_v55 = vmul.f32 %v3396_v2, %v3862_v16 }
 0x5bd   :  { %v937_v39 = vrot.slane %v929_v37, %v3676_v11  ;;  %v944_v40 = vrot.slane %v930_v59, %v3676_v11  ;;  %v3398_v17 = vpop.eup %3397 }
 0x5be   :  { %v1815_v25 = vmul.f32 %v3398_v17, %v3878_v31 }
 0x5bf   :  { %v945_v5 = vcombine.low %v921_v14, %v937_v39  ;;  %v946_v6 = vcombine.high %v921_v14, %v937_v39  ;;  %v961_v18 = vcombine.low %v928_v38, %v944_v40  ;;  %v962_v41 = vcombine.high %v928_v38, %v944_v40 }
 0x5c1   :  { %v953_v42 = vrot.slane %v945_v5, %v3680_v22  ;;  %v960_v43 = vrot.slane %v946_v6, %v3680_v22  ;;  %v969_v7 = vrot.slane %v961_v18, %v3680_v22  ;;  %v976_v8 = vrot.slane %v962_v41, %v3680_v22 }
 0x5c3   :  { %v1049_v9 = vcombine.low %v953_v42, %v960_v43  ;;  %v3070_v53 = vcombine.high %v953_v42, %v960_v43  ;;  %v1065_v10 = vcombine.low %v969_v7, %v976_v8  ;;  %v3071_v52 = vcombine.high %v969_v7, %v976_v8 }
 0x5c5   :  { %v1056_v32 = vrot.slane %v1049_v9, %v3676_v11  ;;  %v1064_v49 = vrot.slane %v3070_v53, %v3676_v11  ;;  %v1072_v44 = vrot.slane %v1065_v10, %v3676_v11  ;;  %v1080_v45 = vrot.slane %v3071_v52, %v3676_v11 }
 0x5c7   :  { %v1081_v47 = vcombine.low %v1056_v32, %v1064_v49  ;;  %v1097_v48 = vcombine.low %v1072_v44, %v1080_v45  ;;  %v1082_v54 = vcombine.high %v1056_v32, %v1064_v49  ;;  %v1098_v60 = vcombine.high %v1072_v44, %v1080_v45 }
 0x5c9   :  { %v1089_v62 = vrot.slane %v1081_v47, %v3680_v22  ;;  %v1105_v0 = vrot.slane %v1097_v48, %v3680_v22  ;;  %v1096_v3 = vrot.slane %v1082_v54, %v3680_v22  ;;  %v1112_v4 = vrot.slane %v1098_v60, %v3680_v22 }
 0x5cb   :  { %v1113_v13 = vcombine.low %v1089_v62, %v1105_v0  ;;  %v1114_v15 = vcombine.high %v1089_v62, %v1105_v0  ;;  %v1115_v23 = vcombine.low %v1096_v3, %v1112_v4  ;;  %v1116_v24 = vcombine.high %v1096_v3, %v1112_v4 }
 0x5cd   :  { %3241 = vmatpush3.msra.mxu0 %v1113_v13  ;;  %3246 = vmatpush3.msra.mxu1 %v1114_v15 }
 0x5ce   :  { %3243 = vmatmul.mubr.msk.f32.vlgmr.msra.gmra.mrb[10].mxu0 %vm1119_vm6, %v1809_v20  ;;  %3248 = vmatmul.mubr.msk.f32.vlgmr.msra.gmra.mrb[16].mxu1 %vm1119_vm6, %v1811_v21 }
 0x5cf   :  { %3250 = vmatprep.subr.mxu0 %v3525_v58  ;;  %3255 = vmatprep.subr.mxu1 %v3525_v58 }
 0x5d0   :  { %3251 = vmatpush3.msra.mxu0 %v1115_v23  ;;  %3256 = vmatpush3.msra.mxu1 %v1116_v24 }
 0x5d1   :  { %3252 = vmatprep.mubr.msk.f32.mxu0 %vm3526_vm5, %v3525_v58  ;;  %3257 = vmatprep.mubr.msk.f32.mxu1 %vm3526_vm5, %v3525_v58 }
 0x5d2   :  { %3253 = vmatmul.mubr.msk.f32.vlgmr.msra.gmra.mrb[12].mxu0 %vm1119_vm6, %v1813_v55  ;;  %3258 = vmatmul.mubr.msk.f32.vlgmr.msra.gmra.mrb[18].mxu1 %vm1119_vm6, %v1815_v25 }
 0x652   :  { %v1885_v12 = vpop.f32.mrb[6].mxu0 }
 0x653   :  { %v3224_v19 = vpop.f32.mrb[7].mxu0 }
 0x656   :  { %v1958_v56 = vpop.f32.mrb[12].mxu1 }
 0x657   :  { %v2031_v50 = vpop.f32.mrb[8].mxu0  ;;  %v3229_v57 = vpop.f32.mrb[13].mxu1 }
 0x658   :  { %v2400_v16 = vcombine.low %v1885_v12, %v2031_v50  ;;  %v2401_v51 = vcombine.high %v1885_v12, %v2031_v50  ;;  %v3234_v31 = vpop.f32.mrb[9].mxu0  ;;  %v2705_v50 = vld [vmem:[#allocation9 + $0x30] sm:$0xff] }
 0x65a   :  { %v2408_v28 = vrot.slane %v2400_v16, %v3676_v11  ;;  %v2415_v58 = vrot.slane %v2401_v51, %v3676_v11 }
 0x65e   :  { %v2104_v63 = vpop.f32.mrb[14].mxu1 }
 0x65f   :  { %v2416_v1 = vcombine.low %v1958_v56, %v2104_v63  ;;  %v2417_v26 = vcombine.high %v1958_v56, %v2104_v63  ;;  %v3239_v27 = vpop.f32.mrb[15].mxu1  ;;  %v2704_v56 = vld [vmem:[#allocation9 + $0x28] sm:$0xff] }
 0x660   :  { %v3309_v63 = vpack.c.bf16 %v2705_v50, %v2704_v56  ;;  %v2845_v56 = vld [vmem:[#allocation9 + $0x58] sm:$0xff]  ;;  %v2846_v50 = vld [vmem:[#allocation9 + $0x60] sm:$0xff] }
 0x661   :  { %v2424_v29 = vrot.slane %v2416_v1, %v3676_v11  ;;  %v2431_v30 = vrot.slane %v2417_v26, %v3676_v11 }
 0x662   :  { %3310 = vmatprep.subr.bf16.mxu0 %v3309_v63 }
 0x663   :  { %v2432_v33 = vcombine.low %v2408_v28, %v2424_v29  ;;  %v2433_v34 = vcombine.high %v2408_v28, %v2424_v29  ;;  %v2448_v35 = vcombine.low %v2415_v58, %v2431_v30  ;;  %v2449_v36 = vcombine.high %v2415_v58, %v2431_v30  ;;  %v2706_v58 = vld [vmem:[#allocation9 + $0x38] sm:$0xff]  ;;  %v2707_v29 = vld [vmem:[#allocation9 + $0x40] sm:$0xff]  ;;  %3312 = vmatpush3.bf16.msra.mxu0 %v3309_v63 }
 0x664   :  { %v2937_v63 = vld [vmem:[#allocation9 + $0x80] sm:$0xff] }
 0x665   :  { %v2440_v37 = vrot.slane %v2432_v33, %v3680_v22  ;;  %v2447_v59 = vrot.slane %v2433_v34, %v3680_v22  ;;  %v2456_v14 = vrot.slane %v2448_v35, %v3680_v22  ;;  %v2463_v38 = vrot.slane %v2449_v36, %v3680_v22 }
 0x666   :  { %v3313_v36 = vpack.c.bf16 %v2707_v29, %v2706_v58  ;;  %v2940_v58 = vld [vmem:[#allocation9 + $0x98] sm:$0xff]  ;;  %v2941_v29 = vld [vmem:[#allocation9 + $0xa0] sm:$0xff] }
 0x667   :  { %v2536_v39 = vcombine.low %v2440_v37, %v2447_v59  ;;  %v3096_v40 = vcombine.high %v2440_v37, %v2447_v59  ;;  %v2552_v5 = vcombine.low %v2456_v14, %v2463_v38  ;;  %v3097_v6 = vcombine.high %v2456_v14, %v2463_v38 }
 0x668   :  { %3314 = vmatprep.subr.bf16.mxu0 %v3313_v36 }
 0x669   :  { %v2543_v18 = vrot.slane %v2536_v39, %v3676_v11  ;;  %v2551_v41 = vrot.slane %v3096_v40, %v3676_v11  ;;  %v2559_v42 = vrot.slane %v2552_v5, %v3676_v11  ;;  %v2567_v43 = vrot.slane %v3097_v6, %v3676_v11  ;;  %3316 = vmatpush3.bf16.msra.mxu0 %v3313_v36 }
 0x66b   :  { %v2568_v7 = vcombine.low %v2543_v18, %v2551_v41  ;;  %v2584_v8 = vcombine.low %v2559_v42, %v2567_v43  ;;  %v2569_v9 = vcombine.high %v2543_v18, %v2551_v41  ;;  %v2585_v53 = vcombine.high %v2559_v42, %v2567_v43 }
 0x66d   :  { %v3961_v10 = vrot.slane %v2568_v7, %v3680_v22  ;;  %v3964_v52 = vrot.slane %v2584_v8, %v3680_v22  ;;  %v2583_v32 = vrot.slane %v2569_v9, %v3680_v22  ;;  %v2599_v49 = vrot.slane %v2585_v53, %v3680_v22 }
 0x66f   :  { %v2601_v44 = vcombine.high %v3961_v10, %v3964_v52  ;;  %v2600_v45 = vcombine.low %v3961_v10, %v3964_v52  ;;  %v2602_v46 = vcombine.low %v2583_v32, %v2599_v49  ;;  %v2603_v47 = vcombine.high %v2583_v32, %v2599_v49 }
 0x671   :  { %2674 = vrot.lane.b32.xlu0 %v2601_v44, %s3518_s28 }
 0x675   :  { %2682 = vrot.lane.b32.xlu0 %v2602_v46, %s3530_s15 }
 0x679   :  { %2690 = vrot.lane.b32.xlu0 %v2603_v47, %s3531_s16 }
 0x6a1   :  { %v2177_v48 = vpop.f32.mrb[10].mxu0  ;;  %v2250_v54 = vpop.f32.mrb[16].mxu1 }
 0x6a2   :  { %v3244_v60 = vpop.f32.mrb[11].mxu0  ;;  %v3249_v61 = vpop.f32.mrb[17].mxu1 }
 0x6a5   :  { %v2323_v62 = vpop.f32.mrb[12].mxu0  ;;  %v2396_v0 = vpop.f32.mrb[18].mxu1 }
 0x6a6   :  { %v2468_v2 = vcombine.low %v2177_v48, %v2323_v62  ;;  %v2469_v3 = vcombine.high %v2177_v48, %v2323_v62  ;;  %v2484_v4 = vcombine.low %v2250_v54, %v2396_v0  ;;  %v2485_v13 = vcombine.high %v2250_v54, %v2396_v0  ;;  %v3254_v15 = vpop.f32.mrb[13].mxu0  ;;  %v3259_v17 = vpop.f32.mrb[19].mxu1  ;;  %v3100_v54 = vld [vmem:[#allocation9 + $0x48] ss:$0 sm:$0xff]  ;;  %v3408_v0 = vld [vmem:[#allocation6] sm:$0xff] }
 0x6a8   :  { %v2476_v20 = vrot.slane %v2468_v2, %v3676_v11  ;;  %v2483_v21 = vrot.slane %v2469_v3, %v3676_v11  ;;  %v2492_v23 = vrot.slane %v2484_v4, %v3676_v11  ;;  %v2499_v24 = vrot.slane %v2485_v13, %v3676_v11 }
 0x6aa   :  { %v2500_v55 = vcombine.low %v2476_v20, %v2492_v23  ;;  %v2501_v25 = vcombine.high %v2476_v20, %v2492_v23  ;;  %v2516_v12 = vcombine.low %v2483_v21, %v2499_v24  ;;  %v2517_v19 = vcombine.high %v2483_v21, %v2499_v24 }
 0x6ac   :  { %v2508_v57 = vrot.slane %v2500_v55, %v3680_v22  ;;  %v2515_v16 = vrot.slane %v2501_v25, %v3680_v22  ;;  %v2524_v51 = vrot.slane %v2516_v12, %v3680_v22  ;;  %v2531_v31 = vrot.slane %v2517_v19, %v3680_v22  ;;  %v2844_v19 = vld [vmem:[#allocation9 + $0x50] sm:$0xff] }
 0x6ae   :  { %v2604_v1 = vcombine.low %v2508_v57, %v2515_v16  ;;  %v3098_v26 = vcombine.high %v2508_v57, %v2515_v16  ;;  %v2620_v27 = vcombine.low %v2524_v51, %v2531_v31  ;;  %v3099_v28 = vcombine.high %v2524_v51, %v2531_v31  ;;  %v2847_v16 = vld [vmem:[#allocation9 + $0x68] sm:$0xff]  ;;  %v2936_v31 = vld [vmem:[#allocation9 + $0x78] sm:$0xff] }
 0x6af   :  { %v3317_v57 = vpack.c.bf16 %v2845_v56, %v2844_v19  ;;  %v3321_v51 = vpack.c.bf16 %v2847_v16, %v2846_v50 }
 0x6b0   :  { %v2611_v30 = vrot.slane %v2604_v1, %v3676_v11  ;;  %v2619_v33 = vrot.slane %v3098_v26, %v3676_v11  ;;  %v2627_v34 = vrot.slane %v2620_v27, %v3676_v11  ;;  %v2635_v35 = vrot.slane %v3099_v28, %v3676_v11  ;;  %v2938_v1 = vld [vmem:[#allocation9 + $0x88] sm:$0xff]  ;;  %v2939_v27 = vld [vmem:[#allocation9 + $0x90] sm:$0xff] }
 0x6b1   :  { %3318 = vmatprep.subr.bf16.mxu1 %v3317_v57  ;;  %v3325_v26 = vpack.c.bf16 %v2937_v63, %v2936_v31  ;;  %v3329_v28 = vpack.c.bf16 %v2939_v27, %v2938_v1 }
 0x6b2   :  { %v2636_v37 = vcombine.low %v2611_v30, %v2619_v33  ;;  %v2652_v59 = vcombine.low %v2627_v34, %v2635_v35  ;;  %v2637_v14 = vcombine.high %v2611_v30, %v2619_v33  ;;  %v2653_v38 = vcombine.high %v2627_v34, %v2635_v35  ;;  %3320 = vmatpush3.bf16.msra.mxu1 %v3317_v57 }
 0x6b3   :  { %3322 = vmatprep.subr.bf16.mxu1 %v3321_v51  ;;  %3326 = vmatprep.subr.bf16.mxu0 %v3325_v26  ;;  %v3333_v30 = vpack.c.bf16 %v2941_v29, %v2940_v58 }
 0x6b4   :  { %v2644_v39 = vrot.slane %v2636_v37, %v3680_v22  ;;  %v2660_v40 = vrot.slane %v2652_v59, %v3680_v22  ;;  %v2651_v5 = vrot.slane %v2637_v14, %v3680_v22  ;;  %v2667_v6 = vrot.slane %v2653_v38, %v3680_v22 }
 0x6b6   :  { %v2669_v18 = vcombine.high %v2644_v39, %v2660_v40  ;;  %v2668_v41 = vcombine.low %v2644_v39, %v2660_v40  ;;  %v2670_v42 = vcombine.low %v2651_v5, %v2667_v6  ;;  %v2671_v11 = vcombine.high %v2651_v5, %v2667_v6  ;;  %3324 = vmatpush3.bf16.msra.mxu1 %v3321_v51 }
 0x6b8   :  { %2676 = vrot.lane.b32.xlu1 %v2669_v18, %s3518_s28 }
 0x6bc   :  { %2684 = vrot.lane.b32.xlu1 %v2670_v42, %s3530_s15 }
 0x6c0   :  { %2692 = vrot.lane.b32.xlu1 %v2671_v11, %s3531_s16 }
 0x6e3   :  { %v2675_v43 = vpop.permute.xlu0 %2674 }
 0x6e4   :  { %v2696_v22 = vsel %vm1119_vm6, %v2600_v45, %v2675_v43  ;;  %v3407_v45 = vld [vmem:[#allocation6 + $0x8] sm:$0xff] }
 0x6e7   :  { %v2683_v7 = vpop.permute.xlu0 %2682 }
 0x6e8   :  { %v2699_v8 = vsel %vm2698_vm7, %v2696_v22, %v2683_v7  ;;  %v2838_v7 = vstv %s3055_s17 }
 0x6eb   :  { %v2691_v9 = vpop.permute.xlu0 %2690 }
 0x6ec   :  { %v2702_v53 = vsel %vm2701_vm8, %v2699_v8, %v2691_v9  ;;  %v2841_v8 = vstv %s3056_s19 }
 0x6ed   :  { %3268 = vmatprep.mubr.msk.f32.mxu0 %vm76_vm0, %v2702_v53 }
 0x72a   :  { %v2677_v32 = vpop.permute.xlu1 %2676 }
 0x72b   :  { %v2697_v44 = vsel %vm1119_vm6, %v2668_v41, %v2677_v32 }
 0x72e   :  { %v2685_v49 = vpop.permute.xlu1 %2684 }
 0x72f   :  { %v2700_v46 = vsel %vm2698_vm7, %v2697_v44, %v2685_v49 }
 0x732   :  { %v2693_v47 = vpop.permute.xlu1 %2692 }
 0x733   :  { %v2703_v48 = vsel %vm2701_vm8, %v2700_v46, %v2693_v47  ;;  %v2942_v47 = vld [vmem:[#allocation9 + $0xa8] sm:$0xff] }
 0x734   :  { %3269 = vmatmul.mubr.msk.f32.vlgmr.msra.gmra.mrb[14].mxu0 %vm76_vm0, %v2703_v48  ;;  %v2943_v48 = vld [vmem:[#allocation9 + $0xb0] sm:$0xff] }
 0x735   :  { %3328 = vmatpush3.bf16.msra.mxu0 %v3325_v26 }
 0x736   :  { %3330 = vmatprep.subr.bf16.mxu0 %v3329_v28 }
 0x739   :  { %3332 = vmatpush3.bf16.msra.mxu0 %v3329_v28 }
 0x73a   :  { %3334 = vmatprep.subr.bf16.mxu0 %v3333_v30 }
 0x73d   :  { %3336 = vmatpush3.bf16.msra.mxu0 %v3333_v30 }
 0x807   :  { %v3270_v60 = vpop.f32.mrb[14].mxu0 }
 0x808   :  { %v2791_v61 = vadd.f32 %v3270_v60, %v3100_v54  ;;  %v2785_v10 = vpop.f32.mrb[15].mxu0  ;;  %v3103_v60 = vld [vmem:[#allocation9 + $0x70] ss:$0 sm:$0xff] }
 0x809   :  { %v2786_v52 = vadd.f32 %v3100_v54, %v2785_v10  ;;  %v3337_v54 = vpack.c.bf16 %v2943_v48, %v2942_v47 }
 0x80a   :  { %v4001_v62 = vadd.f32 %v3407_v45, %v2791_v61 }
 0x80b   :  { %v4003_v2 = vadd.f32 %v3408_v0, %v2786_v52  ;;  %3338 = vmatprep.subr.bf16.mxu0 %v3337_v54 }
 0x80c   :  { %v2799_v3 = vsel %vm76_vm0, %v4001_v62, 0.0  ;;  %3340 = vmatpush3.bf16.msra.mxu0 %v3337_v54 }
 0x80d   :  { %2800 = vadd.xlane.f32.xlu1 %v2799_v3  ;;  %v2796_v4 = vsel %vm76_vm0, %v4003_v2, 0.0 }
 0x80e   :  { %2797 = vadd.xlane.f32.xlu0 %v2796_v4  ;;  %v3106_v4 = vld [vmem:[#allocation9 + $0xb8] ss:$0 sm:$0xff] }
 0x89a   :  { %v2801_v13 = vpop.xlane.xlu1 %2800 }
 0x89b   :  { %v2803_v15 = vmul.f32 0.03125, %v2801_v13  ;;  %v2798_v17 = vpop.xlane.xlu0 %2797 }
 0x89c   :  { %v2802_v20 = vmul.f32 0.03125, %v2798_v17 }
 0x89d   :  { %v4010_v21 = vsub.f32 %v4001_v62, %v2803_v15 }
 0x89e   :  { %v2804_v23 = vsub.f32 %v4003_v2, %v2802_v20 }
 0x89f   :  { %v2807_v25 = vmul.f32 %v4010_v21, %v4010_v21 }
 0x8a0   :  { %v2806_v24 = vmul.f32 %v2804_v23, %v2804_v23 }
 0x8a1   :  { %v2811_v12 = vsel %vm76_vm0, %v2807_v25, 0.0 }
 0x8a2   :  { %v2808_v55 = vsel %vm76_vm0, %v2806_v24, 0.0 }
 0x8a3   :  { %2809 = vadd.xlane.f32.xlu0 %v2808_v55 }
 0x8a7   :  { %2812 = vadd.xlane.f32.xlu0 %v2811_v12 }
 0x930   :  { %v2810_v33 = vpop.xlane.xlu0 %2809 }
 0x931   :  { %v2814_v34 = vmul.f32 0.032258064, %v2810_v33 }
 0x933   :  { %3399 = vrsqrt.f32 %v2814_v34  ;;  %vm2818_vm9 = vcmp.eq.f32.partialorder %v2814_v34, inf  ;;  %v2821_v14 = vand.u32 2147483648, %v2814_v34  ;;  %vm2820_vm10 = vcmp.eq.f32.partialorder %v2814_v34, 0.0 }
 0x934   :  { %v2813_v35 = vpop.xlane.xlu0 %2812 }
 0x935   :  { %v2815_v36 = vmul.f32 0.032258064, %v2813_v35 }
 0x937   :  { %3401 = vrsqrt.f32 %v2815_v36  ;;  %vm2825_vm11 = vcmp.eq.f32.partialorder %v2815_v36, inf  ;;  %v2828_v18 = vand.u32 2147483648, %v2815_v36  ;;  %vm2827_vm12 = vcmp.eq.f32.partialorder %v2815_v36, 0.0 }
 0x93d   :  { %v3400_v37 = vpop.eup %3399 }
 0x93e   :  { %v2817_v59 = vmul.f32 %v3400_v37, %v2814_v34 }
 0x940   :  { %v2819_v38 = vsel %vm2818_vm9, %v2814_v34, %v2817_v59 }
 0x941   :  { %v3402_v39 = vpop.eup %3401  ;;  %v2822_v40 = vsel %vm2820_vm10, %v2821_v14, %v2819_v38 }
 0x942   :  { %v2830_v5 = vadd.f32 1e-06, %v2822_v40  ;;  %v2824_v6 = vmul.f32 %v3402_v39, %v2815_v36 }
 0x944   :  { %3403 = vrcp.f32 %v2830_v5  ;;  %v2826_v41 = vsel %vm2825_vm11, %v2815_v36, %v2824_v6 }
 0x945   :  { %v2829_v42 = vsel %vm2827_vm12, %v2828_v18, %v2826_v41 }
 0x946   :  { %v2831_v11 = vadd.f32 1e-06, %v2829_v42 }
 0x948   :  { %3405 = vrcp.f32 %v2831_v11 }
 0x94e   :  { %v3404_v43 = vpop.eup %3403 }
 0x94f   :  { %v2836_v22 = vmul.f32 %v3404_v43, %v2804_v23 }
 0x951   :  { %v2839_v9 = vmul.f32 %v2838_v7, %v2836_v22 }
 0x952   :  { %v3406_v53 = vpop.eup %3405 }
 0x953   :  { %v2837_v32 = vmul.f32 %v3406_v53, %v4010_v21  ;;  %v2842_v49 = vadd.f32 %v2841_v8, %v2839_v9 }
 0x955   :  { %v2840_v44 = vmul.f32 %v2838_v7, %v2837_v32  ;;  %3279 = vmatprep.mubr.msk.f32.mxu1 %vm76_vm0, %v2842_v49 }
 0x957   :  { %v2843_v46 = vadd.f32 %v2841_v8, %v2840_v44 }
 0x959   :  { %3280 = vmatmul.mubr.msk.f32.vlgmr.msra.gmra.mrb[20].mxu1 %vm76_vm0, %v2843_v46 }
 0xa2c   :  { %v3281_v61 = vpop.f32.mrb[20].mxu1 }
 0xa2d   :  { %v2931_v10 = vadd.f32 %v3281_v61, %v3103_v60  ;;  %v2925_v52 = vpop.f32.mrb[21].mxu1 }
 0xa2e   :  { %v2926_v45 = vadd.f32 %v3103_v60, %v2925_v52 }
 0xa2f   :  { %v2935_v3 = vmax.f32 %v2931_v10, 0.0 }
 0xa30   :  { %v2934_v0 = vmax.f32 %v2926_v45, 0.0 }
 0xa32   :  { %3298 = vmatprep.mubr.msk.f32.mxu0 %vm2949_vm13, %v2934_v0 }
 0xa33   :  { %3299 = vmatmul.mubr.msk.f32.vlgmr.msra.gmra.mrb[16].mxu0 %vm2949_vm13, %v2935_v3 }
 0xb06   :  { %v3300_v13 = vpop.f32.mrb[16].mxu0 }
 0xb07   :  { %v3028_v15 = vadd.f32 %v3300_v13, %v3106_v4  ;;  %v3022_v17 = vpop.f32.mrb[17].mxu0 }
 0xb08   :  { %v3023_v20 = vadd.f32 %v3106_v4, %v3022_v17 }
 0xb09   :  { %v3032_v21 = vadd.f32 %v3028_v15, %v4001_v62 }
 0xb0a   :  { %v3031_v23 = vadd.f32 %v3023_v20, %v4003_v2 }
 0xb0b   :  { %3034 = vst.msk [vmem:[#allocation10 + $0x8] sm:$0xff] %vm76_vm0, %v3032_v21 }
 0xb0c   :  { %3033 = vst.msk [vmem:[#allocation10] sm:$0xff] %vm76_vm0, %v3031_v23 }
 0xb0d   :  { %3496 = shalt.err (!%p3493_p3)
}
 0xb0e   :  { %s3497_s24 = scalar_lea.hbm %s4043_s4, 256 }
 0xb0f   :  { %p3498_p4 = scmp.ne.s32.totalorder %s4043_s4, %s3497_s24  ;;  %p3501_p5 = scmp.lt.u32.totalorder %s3497_s24, %s4043_s4 }
 0xb11   :  { %p3503_p6 = pnand %p3501_p5, %p3498_p4 }
 0xb13   :  { %3506 = shalt.err (!%p3503_p6)
}
 0xb14   :  { %3046 = dma.vmem_to_hbm [thread:$0]  %s3041_s21, 256, %s4043_s4, [#allocation4], %s3517_s27, %s3517_s27, %s3518_s28  }
 0xb15   :  { %3513 = dma.done.wait [#allocation4], 256  }
 0xb16   :  { %3514 = vsyncadd [#allocation4], 4294967040 }
 0xb17   :  { %3050 = vsyncpa [#allocation3], 1 }
 0xb18   :  { %3051 = vsyncpa [#allocation8], 1 }
 0xb19   :  { %3052 = vsyncpa [#allocation4], 1 }
 0xb1a   :  { %3053 = vsyncpa [#allocation5], 1 }

</bundles_post_ra>
